<compile_context>
chip_gen: v5e
topology: v5e:2x2
jax: 0.10.0
libtpu: 0.0.40
codegen_flags: <defaults>
</compile_context>

<pallas_src>
import functools

import jax
import jax.numpy as jnp
from jax.experimental import pallas as pl
from jax.experimental.pallas import tpu as pltpu

IN_DIM = 28 * 28     # 784 (multiple of 8; full-dim block for x's last axis)
H1 = 500
H2 = 100
OUT = 10
H1_PAD = 512         # lane-aligned hidden / output dims
H2_PAD = 128
OUT_PAD = 128


def _round_up(n, m):
    return ((n + m - 1) // m) * m


def _cdiv(a, b):
    return -(-a // b)


def _mlp_kernel(x_ref, w1_ref, b1_ref, w2_ref, b2_ref, w3_ref, b3_ref, o_ref):
    # x tile arrives in its HBM dtype (f32); cast to bf16 here instead of in a separate
    # XLA pass so x is read from HBM exactly once. All dots accumulate in f32 on the MXU;
    # activations drop back to bf16 between layers to keep vreg/VMEM pressure low.
    x = x_ref[...].astype(jnp.bfloat16)

    h1 = jnp.dot(x, w1_ref[...], preferred_element_type=jnp.float32) + b1_ref[...]
    h1 = jnp.maximum(h1, 0.0).astype(jnp.bfloat16)

    h2 = jnp.dot(h1, w2_ref[...], preferred_element_type=jnp.float32) + b2_ref[...]
    h2 = jnp.maximum(h2, 0.0).astype(jnp.bfloat16)

    o = jnp.dot(h2, w3_ref[...], preferred_element_type=jnp.float32) + b3_ref[...]
    o_ref[...] = o.astype(o_ref.dtype)  # lane-dense bf16 store (padded cols are exactly 0)


def prepare_params(w1, b1, w2, b2, w3, b3):
    """Pad feature dims to lane multiples and cast weights to bf16 (biases stay f32).

    Zero padding is exact: padded weight rows/cols contribute 0 and padded bias entries
    are 0, so padded hidden/output columns are identically 0 (and get sliced off).
    """

    def pad2(a, rows, cols):
        return jnp.pad(a, ((0, rows - a.shape[0]), (0, cols - a.shape[1])))

    w1p = pad2(w1, IN_DIM, H1_PAD).astype(jnp.bfloat16)
    w2p = pad2(w2, H1_PAD, H2_PAD).astype(jnp.bfloat16)
    w3p = pad2(w3, H2_PAD, OUT_PAD).astype(jnp.bfloat16)
    b1p = pad2(b1.reshape(1, -1), 1, H1_PAD).astype(jnp.float32)
    b2p = pad2(b2.reshape(1, -1), 1, H2_PAD).astype(jnp.float32)
    b3p = pad2(b3.reshape(1, -1), 1, OUT_PAD).astype(jnp.float32)
    return w1p, b1p, w2p, b2p, w3p, b3p


def _choose_batch_tile(B, tb):
    """Pick the batch tile TB.

    - B <= 256: one full-batch block (block dim == array dim is always legal, even when
      B is not a multiple of 8); splitting tiny batches only adds per-step overhead.
    - Larger B: tiles of at most `tb` rows (rounded to 8 sublanes), with enough grid
      steps that both v7x TensorCores get work (>=2 steps) and, for big batches, each
      core still overlaps DMA with compute (>=4 steps), while keeping wasted rows in
      the partial last block < 8 per tile.
    """
    tb = max(8, _round_up(tb, 8))
    if B <= 256:
        return min(B, tb)
    min_tiles = 4 if B >= 4 * 512 else 2
    n_tiles = max(_cdiv(B, tb), min_tiles)
    return min(tb, _round_up(_cdiv(B, n_tiles), 8))


@functools.partial(jax.jit, static_argnames=("tb",))
def mnist_mlp_forward(x, w1p, b1p, w2p, b2p, w3p, b3p, *, tb=1024):
    """x: (B, 784) float32 (bf16 also accepted). Padded/bf16 params from prepare_params.
    Returns (B, 10) float32 logits."""
    B = x.shape[0]
    TB = _choose_batch_tile(B, tb)
    grid = (_cdiv(B, TB),)

    flops = 2 * B * (IN_DIM * H1_PAD + H1_PAD * H2_PAD + H2_PAD * OUT_PAD)
    bytes_accessed = (
        x.size * x.dtype.itemsize                                      # x read once
        + (w1p.size + w2p.size + w3p.size) * w1p.dtype.itemsize        # resident weights
        + (b1p.size + b2p.size + b3p.size) * 4
        + B * OUT_PAD * 2                                              # bf16 logits out
    )

    out = pl.pallas_call(
        _mlp_kernel,
        out_shape=jax.ShapeDtypeStruct((B, OUT_PAD), jnp.bfloat16),
        grid_spec=pltpu.PrefetchScalarGridSpec(
            num_scalar_prefetch=0,
            grid=grid,
            in_specs=[
                # x: streamed / double-buffered over the batch grid (partial last block
                # is handled by Pallas; no padded HBM copy of x is ever made).
                pl.BlockSpec((TB, IN_DIM), lambda i: (i, 0)),
                # Weights & biases: constant block index -> DMA'd once, VMEM-resident.
                pl.BlockSpec((IN_DIM, H1_PAD), lambda i: (0, 0)),
                pl.BlockSpec((1, H1_PAD), lambda i: (0, 0)),
                pl.BlockSpec((H1_PAD, H2_PAD), lambda i: (0, 0)),
                pl.BlockSpec((1, H2_PAD), lambda i: (0, 0)),
                pl.BlockSpec((H2_PAD, OUT_PAD), lambda i: (0, 0)),
                pl.BlockSpec((1, OUT_PAD), lambda i: (0, 0)),
            ],
            out_specs=pl.BlockSpec((TB, OUT_PAD), lambda i: (i, 0)),
        ),
        compiler_params=pltpu.CompilerParams(
            # Batch axis is embarrassingly parallel -> shard across v7x's 2 TensorCores.
            dimension_semantics=("parallel",),
            # Explicit limit so TB=1024 f32 x tiles (+resident weights) compile on v5e's
            # 16 MiB scoped default; 32 MiB fits every generation's physical VMEM.
            vmem_limit_bytes=32 * 1024 * 1024,
        ),
        cost_estimate=pl.CostEstimate(
            flops=flops, transcendentals=0, bytes_accessed=bytes_accessed
        ),
    )(x, w1p, b1p, w2p, b2p, w3p, b3p)

    # Strip lane padding of the 10-wide logits and return f32 (tiny (B,10) op).
    # TODO(synk): if a consumer (argmax / softmax-CE) exists, fuse it into the kernel so
    # only (B,) or (B,10) ever leaves HBM instead of the padded (B,128) slab.
    return out[:, :OUT].astype(jnp.float32)


def init_linear_params(key, in_features, out_features):
    """Deterministic init matching PyTorch nn.Linear's default scale:
    U(-1/sqrt(fan_in), 1/sqrt(fan_in)) for both weight and bias."""
    kw, kb = jax.random.split(key)
    bound = 1.0 / jnp.sqrt(jnp.float32(in_features))
    # Stored as [in, out] (transpose of PyTorch's [out, in]).
    w = jax.random.uniform(
        kw, (in_features, out_features), jnp.float32, minval=-bound, maxval=bound
    )
    b = jax.random.uniform(
        kb, (out_features,), jnp.float32, minval=-bound, maxval=bound
    )
    return w, b


def reference_forward(x, w1, b1, w2, b2, w3, b3):
    h1 = jnp.maximum(x @ w1 + b1, 0.0)
    h2 = jnp.maximum(h1 @ w2 + b2, 0.0)
    return h2 @ w3 + b3


if __name__ == "__main__":
    key = jax.random.PRNGKey(0)
    k_x, k1, k2, k3 = jax.random.split(key, 4)

    w1, b1 = init_linear_params(k1, IN_DIM, H1)
    w2, b2 = init_linear_params(k2, H1, H2)
    w3, b3 = init_linear_params(k3, H2, OUT)
    params = prepare_params(w1, b1, w2, b2, w3, b3)

    # Small smoke test (single full-batch tile).
    B = 8
    x = jax.random.normal(k_x, (B, IN_DIM), dtype=jnp.float32)
    out = jax.block_until_ready(mnist_mlp_forward(x, *params))
    ref = reference_forward(x, w1, b1, w2, b2, w3, b3)
    assert out.shape == (B, OUT)
    # bf16 weights/activations/output (f32 MXU accumulation) vs f32 reference.
    assert jnp.allclose(out, ref, atol=5e-2, rtol=5e-2), "mismatch vs reference (B=8)"

    # Odd batch exercising the multi-tile + partial-last-block path (no HBM padding).
    B2 = 300
    x2 = jax.random.normal(k_x, (B2, IN_DIM), dtype=jnp.float32)
    out2 = jax.block_until_ready(mnist_mlp_forward(x2, *params, tb=128))
    ref2 = reference_forward(x2, w1, b1, w2, b2, w3, b3)
    assert out2.shape == (B2, OUT)
    assert jnp.allclose(out2, ref2, atol=5e-2, rtol=5e-2), "mismatch vs reference (B=300)"

    print("KERNEL_OK")
</pallas_src>

<mosaic_0001>
module attributes {stable_mosaic.version = 11 : i64} {
  func.func @_mlp_kernel(%arg0: i32, %arg1: memref<8x784xf32, #tpu.memory_space<vmem>>, %arg2: memref<784x512xbf16, #tpu.memory_space<vmem>>, %arg3: memref<1x512xf32, #tpu.memory_space<vmem>>, %arg4: memref<512x128xbf16, #tpu.memory_space<vmem>>, %arg5: memref<1x128xf32, #tpu.memory_space<vmem>>, %arg6: memref<128x128xbf16, #tpu.memory_space<vmem>>, %arg7: memref<1x128xf32, #tpu.memory_space<vmem>>, %arg8: memref<8x128xbf16, #tpu.memory_space<vmem>>) attributes {dimension_semantics = [#tpu.dimension_semantics<parallel>], iteration_bounds = array<i64: 1>, scalar_prefetch = 0 : i64, scratch_operands = 0 : i64, tpu.core_type = #tpu.core_type<tc>, window_params = [{transform_indices = @transform_0, window_bounds = array<i64: 8, 784>}, {pipeline_mode = #tpu.pipeline_mode<synchronous>, transform_indices = @transform_1, window_bounds = array<i64: 784, 512>}, {pipeline_mode = #tpu.pipeline_mode<synchronous>, transform_indices = @transform_2, window_bounds = array<i64: 1, 512>}, {pipeline_mode = #tpu.pipeline_mode<synchronous>, transform_indices = @transform_3, window_bounds = array<i64: 512, 128>}, {pipeline_mode = #tpu.pipeline_mode<synchronous>, transform_indices = @transform_4, window_bounds = array<i64: 1, 128>}, {pipeline_mode = #tpu.pipeline_mode<synchronous>, transform_indices = @transform_5, window_bounds = array<i64: 128, 128>}, {pipeline_mode = #tpu.pipeline_mode<synchronous>, transform_indices = @transform_6, window_bounds = array<i64: 1, 128>}, {transform_indices = @transform_7, window_bounds = array<i64: 8, 128>}]} {
    %c0 = arith.constant 0 : index
    %c0_0 = arith.constant 0 : index
    %0 = vector.load %arg1[%c0, %c0_0] : memref<8x784xf32, #tpu.memory_space<vmem>>, vector<8x784xf32>
    %1 = arith.truncf %0 : vector<8x784xf32> to vector<8x784xbf16>
    %c0_1 = arith.constant 0 : index
    %c0_2 = arith.constant 0 : index
    %2 = vector.load %arg2[%c0_1, %c0_2] : memref<784x512xbf16, #tpu.memory_space<vmem>>, vector<784x512xbf16>
    %cst = arith.constant dense<0.000000e+00> : vector<8x512xf32>
    %3 = tpu.matmul %1, %2, %cst {dimension_numbers = #tpu.dot_dimension_numbers<[1], [0], [0], [1], [0, 0, 1, 1], [], []>} : vector<8x784xbf16>, vector<784x512xbf16>, vector<8x512xf32> -> vector<8x512xf32>
    %c0_3 = arith.constant 0 : index
    %c0_4 = arith.constant 0 : index
    %4 = vector.load %arg3[%c0_3, %c0_4] : memref<1x512xf32, #tpu.memory_space<vmem>>, vector<1x512xf32>
    %5 = vector.broadcast %4 : vector<1x512xf32> to vector<8x512xf32>
    %6 = arith.addf %3, %5 : vector<8x512xf32>
    %cst_5 = arith.constant 0.000000e+00 : f32
    %7 = vector.broadcast %cst_5 : f32 to vector<8x512xf32>
    %8 = arith.maximumf %6, %7 : vector<8x512xf32>
    %9 = arith.truncf %8 : vector<8x512xf32> to vector<8x512xbf16>
    %c0_6 = arith.constant 0 : index
    %c0_7 = arith.constant 0 : index
    %10 = vector.load %arg4[%c0_6, %c0_7] : memref<512x128xbf16, #tpu.memory_space<vmem>>, vector<512x128xbf16>
    %cst_8 = arith.constant dense<0.000000e+00> : vector<8x128xf32>
    %11 = tpu.matmul %9, %10, %cst_8 {dimension_numbers = #tpu.dot_dimension_numbers<[1], [0], [0], [1], [0, 0, 1, 1], [], []>} : vector<8x512xbf16>, vector<512x128xbf16>, vector<8x128xf32> -> vector<8x128xf32>
    %c0_9 = arith.constant 0 : index
    %c0_10 = arith.constant 0 : index
    %12 = vector.load %arg5[%c0_9, %c0_10] : memref<1x128xf32, #tpu.memory_space<vmem>>, vector<1x128xf32>
    %13 = vector.broadcast %12 : vector<1x128xf32> to vector<8x128xf32>
    %14 = arith.addf %11, %13 : vector<8x128xf32>
    %cst_11 = arith.constant 0.000000e+00 : f32
    %15 = vector.broadcast %cst_11 : f32 to vector<8x128xf32>
    %16 = arith.maximumf %14, %15 : vector<8x128xf32>
    %17 = arith.truncf %16 : vector<8x128xf32> to vector<8x128xbf16>
    %c0_12 = arith.constant 0 : index
    %c0_13 = arith.constant 0 : index
    %18 = vector.load %arg6[%c0_12, %c0_13] : memref<128x128xbf16, #tpu.memory_space<vmem>>, vector<128x128xbf16>
    %cst_14 = arith.constant dense<0.000000e+00> : vector<8x128xf32>
    %19 = tpu.matmul %17, %18, %cst_14 {dimension_numbers = #tpu.dot_dimension_numbers<[1], [0], [0], [1], [0, 0, 1, 1], [], []>} : vector<8x128xbf16>, vector<128x128xbf16>, vector<8x128xf32> -> vector<8x128xf32>
    %c0_15 = arith.constant 0 : index
    %c0_16 = arith.constant 0 : index
    %20 = vector.load %arg7[%c0_15, %c0_16] : memref<1x128xf32, #tpu.memory_space<vmem>>, vector<1x128xf32>
    %21 = vector.broadcast %20 : vector<1x128xf32> to vector<8x128xf32>
    %22 = arith.addf %19, %21 : vector<8x128xf32>
    %23 = arith.truncf %22 : vector<8x128xf32> to vector<8x128xbf16>
    %c0_17 = arith.constant 0 : index
    %c0_18 = arith.constant 0 : index
    %24 = vector.load %arg8[%c0_17, %c0_18] : memref<8x128xbf16, #tpu.memory_space<vmem>>, vector<8x128xbf16>
    tpu.vector_store %arg8[%c0_17, %c0_18], %23 {strides = array<i32>} : memref<8x128xbf16, #tpu.memory_space<vmem>>, vector<8x128xbf16>,
    return
  }
  func.func @transform_0(%arg0: i32) -> (i32, i32) {
    %c0_i32 = arith.constant 0 : i32
    %c0_i32_0 = arith.constant 0 : i32
    return %arg0, %c0_i32 : i32, i32
  }
  func.func @transform_1(%arg0: i32) -> (i32, i32) {
    %c0_i32 = arith.constant 0 : i32
    %c0_i32_0 = arith.constant 0 : i32
    %c0_i32_1 = arith.constant 0 : i32
    return %c0_i32, %c0_i32_0 : i32, i32
  }
  func.func @transform_2(%arg0: i32) -> (i32, i32) {
    %c0_i32 = arith.constant 0 : i32
    %c0_i32_0 = arith.constant 0 : i32
    %c0_i32_1 = arith.constant 0 : i32
    return %c0_i32, %c0_i32_0 : i32, i32
  }
  func.func @transform_3(%arg0: i32) -> (i32, i32) {
    %c0_i32 = arith.constant 0 : i32
    %c0_i32_0 = arith.constant 0 : i32
    %c0_i32_1 = arith.constant 0 : i32
    return %c0_i32, %c0_i32_0 : i32, i32
  }
  func.func @transform_4(%arg0: i32) -> (i32, i32) {
    %c0_i32 = arith.constant 0 : i32
    %c0_i32_0 = arith.constant 0 : i32
    %c0_i32_1 = arith.constant 0 : i32
    return %c0_i32, %c0_i32_0 : i32, i32
  }
  func.func @transform_5(%arg0: i32) -> (i32, i32) {
    %c0_i32 = arith.constant 0 : i32
    %c0_i32_0 = arith.constant 0 : i32
    %c0_i32_1 = arith.constant 0 : i32
    return %c0_i32, %c0_i32_0 : i32, i32
  }
  func.func @transform_6(%arg0: i32) -> (i32, i32) {
    %c0_i32 = arith.constant 0 : i32
    %c0_i32_0 = arith.constant 0 : i32
    %c0_i32_1 = arith.constant 0 : i32
    return %c0_i32, %c0_i32_0 : i32, i32
  }
  func.func @transform_7(%arg0: i32) -> (i32, i32) {
    %c0_i32 = arith.constant 0 : i32
    %c0_i32_0 = arith.constant 0 : i32
    return %arg0, %c0_i32 : i32, i32
  }
}

</mosaic_0001>

<bundles_post_ra>
// kernel: mnist_mlp_forward.1
= control target key start
LH: loop header
LB: loop body
LE: loop exit
PB: predicated region body
PF: predicated region fallthrough
CT: control target
= control target key end

     0   :  { %12 = vsyncpa [#allocation3], 0  ;;  %s3539_s0 = inlined_call_operand.hbm [shape: f32[8,784], index: 0, kind: input, shape index: {}]   ;;  %s3540_s1 = inlined_call_operand.hbm [shape: bf16[784,512], index: 1, kind: input, shape index: {}]   ;;  %s3541_s2 = inlined_call_operand.hbm [shape: f32[1,512], index: 2, kind: input, shape index: {}]   ;;  %s3542_s3 = inlined_call_operand.hbm [shape: bf16[512,128], index: 3, kind: input, shape index: {}]   ;;  %s3543_s4 = inlined_call_operand.vmem [shape: f32[1,128], index: 4, kind: input, shape index: {}]   ;;  %s3544_s5 = inlined_call_operand.hbm [shape: bf16[128,128], index: 5, kind: input, shape index: {}]   ;;  %s3545_s6 = inlined_call_operand.vmem [shape: f32[1,128], index: 6, kind: input, shape index: {}]   ;;  %s3546_s7 = inlined_call_operand.vmem [shape: bf16[8,128], index: 7, kind: output, shape index: {}]  }
   0x1   :  { %13 = vsyncpa [#allocation5], 0  ;;  %s30_s26 = sshll.u32 %s3540_s1, 4  ;;  %s31_s26 = int_to_ptr.hbm [resolvable:$true] %s30_s26 }
   0x2   :  { %14 = vsyncpa [#allocation8], 0  ;;  %s3402_s27 = smov [#allocation4]   ;;  %s54_s8 = sshll.u32 %s3542_s3, 4  ;;  %s55_s8 = int_to_ptr.hbm [resolvable:$true] %s54_s8 }
   0x3   :  { %s32_s28 = sshll.u32 %s3402_s27, 4  ;;  %s3403_s9 = smov 256   ;;  %s33_s28 = int_to_ptr.vmem [resolvable:$true] %s32_s28 }
   0x4   :  { %s3404_s10 = smov 16   ;;  %s3405_s11 = smov [#allocation7]  }
   0x5   :  { %38 = dma.hbm_to_vmem [thread:$0]  %s31_s26, 25088, %s33_s28, [#allocation5], %s3403_s9, %s3403_s9, %s3404_s10  }
   0x6   :  { %s56_s12 = sshll.u32 %s3405_s11, 4  ;;  %s3406_s13 = smov 64   ;;  %s57_s12 = int_to_ptr.vmem [resolvable:$true] %s56_s12 }
   0x7   :  { %s3407_s14 = smov 4   ;;  %s20_s16 = sshll.u32 %s3539_s0, 4  ;;  %s21_s16 = int_to_ptr.hbm [resolvable:$true] %s20_s16 }
   0x8   :  { %62 = dma.hbm_to_vmem [thread:$0]  %s55_s8, 4096, %s57_s12, [#allocation8], %s3406_s13, %s3406_s13, %s3407_s14  }
   0x9   :  { %s3408_s17 = smov [#allocation2]   ;;  %s44_s20 = sshll.u32 %s3541_s2, 4  ;;  %s45_s20 = int_to_ptr.hbm [resolvable:$true] %s44_s20 }
   0xa   :  { %s22_s18 = sshll.u32 %s3408_s17, 4  ;;  %s3409_s21 = smov [#allocation6]   ;;  %s23_s18 = int_to_ptr.vmem [resolvable:$true] %s22_s18 }
   0xb   :  { %25 = dma.hbm_to_vmem [thread:$0]  %s21_s16, 896, %s23_s18, [#allocation3]  }
   0xc   :  { %s46_s22 = sshll.u32 %s3409_s21, 4  ;;  %s69_s25 = sshll.u32 %s3544_s5, 4  ;;  %s47_s22 = int_to_ptr.vmem [resolvable:$true] %s46_s22  ;;  %s70_s25 = int_to_ptr.hbm [resolvable:$true] %s69_s25 }
   0xd   :  { %49 = dma.hbm_to_vmem [thread:$0]  %s45_s20, 64, %s47_s22, [#allocation5]  }
   0xe   :  { %s3410_s0 = smov [#allocation9]  }
   0xf   :  { %s71_s26 = sshll.u32 %s3410_s0, 4  ;;  %s72_s26 = int_to_ptr.vmem [resolvable:$true] %s71_s26 }
  0x10   :  { %77 = dma.hbm_to_vmem [thread:$0]  %s70_s25, 1024, %s72_s26, [#allocation8], %s3406_s13, %s3406_s13, %s3407_s14  }
  0x11   :  { %3396 = dma.done.wait [#allocation3], 896  }
  0x12   :  { %3397 = vsyncadd [#allocation3], 4294966400 }
  0x13   :  { %3398 = dma.done.wait [#allocation5], 25152  }
  0x14   :  { %3399 = vsyncadd [#allocation5], 4294942144 }
  0x15   :  { %3400 = dma.done.wait [#allocation8], 5120  }
  0x16   :  { %3401 = vsyncadd [#allocation8], 4294962176  ;;  %v2195_v0 = vld [vmem:[#allocation4 + $0xe0] sm:$0xf]  ;;  %v3059_v1 = vld [vmem:[#allocation4 + $0xec] sm:$0xf0] }
  0x17   :  { %v2323_v2 = vld [vmem:[#allocation4 + $0x1e0] sm:$0xf]  ;;  %v2196_v3 = vor.u32 %v3059_v1, %v2195_v0  ;;  %v3091_v4 = vld [vmem:[#allocation4 + $0x1ec] sm:$0xf0]  ;;  %vm1301_vm0 = vcmask 130048  }
  0x18   :  { %v2451_v5 = vld [vmem:[#allocation4 + $0x2e0] sm:$0xf]  ;;  %v3123_v6 = vld [vmem:[#allocation4 + $0x2ec] sm:$0xf0]  ;;  %v2324_v7 = vor.u32 %v3091_v4, %v2323_v2 }
  0x19   :  { %v2452_v8 = vor.u32 %v3123_v6, %v2451_v5  ;;  %v2579_v9 = vld [vmem:[#allocation4 + $0x3e0] sm:$0xf]  ;;  %v3155_v10 = vld [vmem:[#allocation4 + $0x3ec] sm:$0xf0]  ;;  %1305 = vmatpush.bf16.msra.mxu0 %v2196_v3 }
  0x1a   :  { %v2179_v11 = vld [vmem:[#allocation4 + $0xc0] sm:$0xf]  ;;  %v2580_v12 = vor.u32 %v3155_v10, %v2579_v9  ;;  %v3055_v13 = vld [vmem:[#allocation4 + $0xcc] sm:$0xf0]  ;;  %1318 = vmatpush.bf16.msra.mxu1 %v2324_v7 }
  0x1b   :  { %v2307_v14 = vld [vmem:[#allocation4 + $0x1c0] sm:$0xf]  ;;  %v3087_v15 = vld [vmem:[#allocation4 + $0x1cc] sm:$0xf0]  ;;  %1331 = vmatpush.bf16.msra.mxu2 %v2452_v8  ;;  %v2180_v16 = vor.u32 %v3055_v13, %v2179_v11 }
  0x1c   :  { %v2308_v17 = vor.u32 %v3087_v15, %v2307_v14  ;;  %v2435_v18 = vld [vmem:[#allocation4 + $0x2c0] sm:$0xf]  ;;  %v3119_v19 = vld [vmem:[#allocation4 + $0x2cc] sm:$0xf0]  ;;  %1344 = vmatpush.bf16.msra.mxu3 %v2580_v12 }
  0x1d   :  { %v2563_v20 = vld [vmem:[#allocation4 + $0x3c0] sm:$0xf]  ;;  %v2436_v21 = vor.u32 %v3119_v19, %v2435_v18  ;;  %v3151_v22 = vld [vmem:[#allocation4 + $0x3cc] sm:$0xf0]  ;;  %1306 = vmatpush.bf16.msra.mxu0 %v2180_v16 }
  0x1e   :  { %v2163_v23 = vld [vmem:[#allocation4 + $0xa0] sm:$0xf]  ;;  %v3051_v24 = vld [vmem:[#allocation4 + $0xac] sm:$0xf0]  ;;  %v2564_v25 = vor.u32 %v3151_v22, %v2563_v20  ;;  %1319 = vmatpush.bf16.msra.mxu1 %v2308_v17 }
  0x1f   :  { %v2291_v26 = vld [vmem:[#allocation4 + $0x1a0] sm:$0xf]  ;;  %v3083_v27 = vld [vmem:[#allocation4 + $0x1ac] sm:$0xf0]  ;;  %v2164_v29 = vor.u32 %v3051_v24, %v2163_v23  ;;  %1332 = vmatpush.bf16.msra.mxu2 %v2436_v21 }
  0x20   :  { %v2419_v28 = vld [vmem:[#allocation4 + $0x2a0] sm:$0xf]  ;;  %v3115_v30 = vld [vmem:[#allocation4 + $0x2ac] sm:$0xf0]  ;;  %v2292_v33 = vor.u32 %v3083_v27, %v2291_v26  ;;  %1345 = vmatpush.bf16.msra.mxu3 %v2564_v25 }
  0x21   :  { %v2547_v31 = vld [vmem:[#allocation4 + $0x3a0] sm:$0xf]  ;;  %v3147_v32 = vld [vmem:[#allocation4 + $0x3ac] sm:$0xf0]  ;;  %v2420_v34 = vor.u32 %v3115_v30, %v2419_v28  ;;  %1307 = vmatpush.bf16.msra.mxu0 %v2164_v29 }
  0x22   :  { %v2147_v35 = vld [vmem:[#allocation4 + $0x80] sm:$0xf]  ;;  %v3047_v36 = vld [vmem:[#allocation4 + $0x8c] sm:$0xf0]  ;;  %v2548_v38 = vor.u32 %v3147_v32, %v2547_v31  ;;  %1320 = vmatpush.bf16.msra.mxu1 %v2292_v33  ;;  %v3057_v33 = vld [vmem:[#allocation4 + $0xe4] sm:$0xf] }
  0x23   :  { %v2275_v37 = vld [vmem:[#allocation4 + $0x180] sm:$0xf]  ;;  %v3079_v39 = vld [vmem:[#allocation4 + $0x18c] sm:$0xf0]  ;;  %v2148_v44 = vor.u32 %v3047_v36, %v2147_v35  ;;  %1333 = vmatpush.bf16.msra.mxu2 %v2420_v34  ;;  %v2197_v34 = vld [vmem:[#allocation4 + $0xf0] sm:$0xf0] }
  0x24   :  { %v2403_v40 = vld [vmem:[#allocation4 + $0x280] sm:$0xf]  ;;  %v3111_v41 = vld [vmem:[#allocation4 + $0x28c] sm:$0xf0]  ;;  %v2276_v45 = vor.u32 %v3079_v39, %v2275_v37  ;;  %1346 = vmatpush.bf16.msra.mxu3 %v2548_v38  ;;  %v103_v35 = vld [vmem:[#allocation2 + $0x10] sm:$0xff] }
  0x25   :  { %v2531_v42 = vld [vmem:[#allocation4 + $0x380] sm:$0xf]  ;;  %v3143_v43 = vld [vmem:[#allocation4 + $0x38c] sm:$0xf0]  ;;  %v2404_v46 = vor.u32 %v3111_v41, %v2403_v40  ;;  %1308 = vmatpush.bf16.msra.mxu0 %v2148_v44  ;;  %v101_v40 = vld [vmem:[#allocation2] sm:$0xff] }
  0x26   :  { %v2131_v47 = vld [vmem:[#allocation4 + $0x60] sm:$0xf]  ;;  %v3043_v48 = vld [vmem:[#allocation4 + $0x6c] sm:$0xf0]  ;;  %v2532_v50 = vor.u32 %v3143_v43, %v2531_v42  ;;  %1321 = vmatpush.bf16.msra.mxu1 %v2276_v45  ;;  %v3089_v43 = vld [vmem:[#allocation4 + $0x1e4] sm:$0xf] }
  0x27   :  { %v2259_v49 = vld [vmem:[#allocation4 + $0x160] sm:$0xf]  ;;  %v3075_v51 = vld [vmem:[#allocation4 + $0x16c] sm:$0xf0]  ;;  %v2132_v56 = vor.u32 %v3043_v48, %v2131_v47  ;;  %1334 = vmatpush.bf16.msra.mxu2 %v2404_v46  ;;  %v2325_v44 = vld [vmem:[#allocation4 + $0x1f0] sm:$0xf0]  ;;  %v2200_v47 = vor.u32 %v3057_v33, %v2197_v34 }
  0x28   :  { %v2387_v52 = vld [vmem:[#allocation4 + $0x260] sm:$0xf]  ;;  %v3107_v53 = vld [vmem:[#allocation4 + $0x26c] sm:$0xf0]  ;;  %v2260_v57 = vor.u32 %v3075_v51, %v2259_v49  ;;  %1347 = vmatpush.bf16.msra.mxu3 %v2532_v50  ;;  %v3466_v51 = vpack.c.bf16 %v103_v35, %v103_v35  ;;  %v3073_v35 = vld [vmem:[#allocation4 + $0x164] sm:$0xf] }
  0x29   :  { %v2515_v54 = vld [vmem:[#allocation4 + $0x360] sm:$0xf]  ;;  %v3139_v55 = vld [vmem:[#allocation4 + $0x36c] sm:$0xf0]  ;;  %v2388_v58 = vor.u32 %v3107_v53, %v2387_v52  ;;  %1309 = vmatpush.bf16.msra.mxu0 %v2132_v56  ;;  %v3053_v53 = vld [vmem:[#allocation4 + $0xc4] sm:$0xf] }
  0x2a   :  { %v2115_v59 = vld [vmem:[#allocation4 + $0x40] sm:$0xf]  ;;  %v3039_v60 = vld [vmem:[#allocation4 + $0x4c] sm:$0xf0]  ;;  %v2516_v62 = vor.u32 %v3139_v55, %v2515_v54  ;;  %1322 = vmatpush.bf16.msra.mxu1 %v2260_v57  ;;  %v2181_v54 = vld [vmem:[#allocation4 + $0xd0] sm:$0xf0]  ;;  %v3468_v55 = vpack.c.bf16 %v101_v40, %v101_v40 }
  0x2b   :  { %v2243_v61 = vld [vmem:[#allocation4 + $0x140] sm:$0xf]  ;;  %v3071_v63 = vld [vmem:[#allocation4 + $0x14c] sm:$0xf0]  ;;  %v2116_v4 = vor.u32 %v3039_v60, %v2115_v59  ;;  %1335 = vmatpush.bf16.msra.mxu2 %v2388_v58  ;;  %v2328_v59 = vor.u32 %v3089_v43, %v2325_v44  ;;  %v3037_v43 = vld [vmem:[#allocation4 + $0x44] sm:$0xf] }
  0x2c   :  { %v2371_v0 = vld [vmem:[#allocation4 + $0x240] sm:$0xf]  ;;  %v3103_v1 = vld [vmem:[#allocation4 + $0x24c] sm:$0xf0]  ;;  %v2244_v5 = vor.u32 %v3071_v63, %v2243_v61  ;;  %1348 = vmatpush.bf16.msra.mxu3 %v2516_v62  ;;  %v3085_v61 = vld [vmem:[#allocation4 + $0x1c4] sm:$0xf] }
  0x2d   :  { %v2499_v2 = vld [vmem:[#allocation4 + $0x340] sm:$0xf]  ;;  %v3135_v3 = vld [vmem:[#allocation4 + $0x34c] sm:$0xf0]  ;;  %v2372_v6 = vor.u32 %v3103_v1, %v2371_v0  ;;  %1310 = vmatpush.bf16.msra.mxu0 %v2116_v4  ;;  %v2309_v62 = vld [vmem:[#allocation4 + $0x1d0] sm:$0xf0]  ;;  %v2184_v0 = vor.u32 %v3053_v53, %v2181_v54 }
  0x2e   :  { %v2099_v7 = vld [vmem:[#allocation4 + $0x20] sm:$0xf]  ;;  %v3035_v8 = vld [vmem:[#allocation4 + $0x2c] sm:$0xf0]  ;;  %v2500_v10 = vor.u32 %v3135_v3, %v2499_v2  ;;  %1323 = vmatpush.bf16.msra.mxu1 %v2244_v5  ;;  %v3049_v5 = vld [vmem:[#allocation4 + $0xa4] sm:$0xf] }
  0x2f   :  { %v2227_v9 = vld [vmem:[#allocation4 + $0x120] sm:$0xf]  ;;  %v3067_v11 = vld [vmem:[#allocation4 + $0x12c] sm:$0xf0]  ;;  %v2100_v16 = vor.u32 %v3035_v8, %v2099_v7  ;;  %1336 = vmatpush.bf16.msra.mxu2 %v2372_v6  ;;  %v2165_v6 = vld [vmem:[#allocation4 + $0xb0] sm:$0xf0]  ;;  %v2312_v8 = vor.u32 %v3085_v61, %v2309_v62 }
  0x30   :  { %v2355_v12 = vld [vmem:[#allocation4 + $0x220] sm:$0xf]  ;;  %v3099_v13 = vld [vmem:[#allocation4 + $0x22c] sm:$0xf0]  ;;  %v2228_v20 = vor.u32 %v3067_v11, %v2227_v9  ;;  %1349 = vmatpush.bf16.msra.mxu3 %v2500_v10  ;;  %v3081_v10 = vld [vmem:[#allocation4 + $0x1a4] sm:$0xf] }
  0x31   :  { %v2483_v14 = vld [vmem:[#allocation4 + $0x320] sm:$0xf]  ;;  %v3131_v15 = vld [vmem:[#allocation4 + $0x32c] sm:$0xf0]  ;;  %v2356_v21 = vor.u32 %v3099_v13, %v2355_v12  ;;  %1311 = vmatpush.bf16.msra.mxu0 %v2100_v16  ;;  %v2293_v11 = vld [vmem:[#allocation4 + $0x1b0] sm:$0xf0]  ;;  %v2168_v13 = vor.u32 %v3049_v5, %v2165_v6 }
  0x32   :  { %v2083_v17 = vld [vmem:[#allocation4] sm:$0xf]  ;;  %v3031_v18 = vld [vmem:[#allocation4 + $0xc] sm:$0xf0]  ;;  %v2484_v25 = vor.u32 %v3131_v15, %v2483_v14  ;;  %1324 = vmatpush.bf16.msra.mxu1 %v2228_v20  ;;  %v2296_v20 = vor.u32 %v3081_v10, %v2293_v11  ;;  %v2117_v44 = vld [vmem:[#allocation4 + $0x50] sm:$0xf0] }
  0x33   :  { %v2211_v19 = vld [vmem:[#allocation4 + $0x100] sm:$0xf]  ;;  %v3063_v22 = vld [vmem:[#allocation4 + $0x10c] sm:$0xf0]  ;;  %v2084_v32 = vor.u32 %v3031_v18, %v2083_v17  ;;  %1337 = vmatpush.bf16.msra.mxu2 %v2356_v21  ;;  %v3045_v18 = vld [vmem:[#allocation4 + $0x84] sm:$0xf] }
  0x34   :  { %v2339_v23 = vld [vmem:[#allocation4 + $0x200] sm:$0xf]  ;;  %v3095_v24 = vld [vmem:[#allocation4 + $0x20c] sm:$0xf0]  ;;  %v2212_v36 = vor.u32 %v3063_v22, %v2211_v19  ;;  %1350 = vmatpush.bf16.msra.mxu3 %v2484_v25  ;;  %v2149_v19 = vld [vmem:[#allocation4 + $0x90] sm:$0xf0] }
  0x35   :  { %v2467_v26 = vld [vmem:[#allocation4 + $0x300] sm:$0xf]  ;;  %v3127_v27 = vld [vmem:[#allocation4 + $0x30c] sm:$0xf0]  ;;  %v2340_v37 = vor.u32 %v3095_v24, %v2339_v23  ;;  %1312 = vmatpush.bf16.msra.mxu0 %v2084_v32  ;;  %v3077_v22 = vld [vmem:[#allocation4 + $0x184] sm:$0xf]  ;;  %v2152_v25 = vor.u32 %v3045_v18, %v2149_v19 }
  0x36   :  { %v2707_v28 = vld [vmem:[#allocation4 + $0x4e0] sm:$0xf]  ;;  %v3187_v29 = vld [vmem:[#allocation4 + $0x4ec] sm:$0xf0]  ;;  %v2468_v41 = vor.u32 %v3127_v27, %v2467_v26  ;;  %1325 = vmatpush.bf16.msra.mxu1 %v2212_v36  ;;  %v2277_v23 = vld [vmem:[#allocation4 + $0x190] sm:$0xf0] }
  0x37   :  { %v2835_v30 = vld [vmem:[#allocation4 + $0x5e0] sm:$0xf]  ;;  %v3219_v31 = vld [vmem:[#allocation4 + $0x5ec] sm:$0xf0]  ;;  %v2708_v42 = vor.u32 %v3187_v29, %v2707_v28  ;;  %1338 = vmatpush.bf16.msra.mxu2 %v2340_v37  ;;  %v107_v32 = vld [vmem:[#allocation2 + $0x30] sm:$0xff]  ;;  %v2280_v33 = vor.u32 %v3077_v22, %v2277_v23 }
  0x38   :  { %v2851_v38 = vld [vmem:[#allocation4 + $0x600] sm:$0xf]  ;;  %v3223_v39 = vld [vmem:[#allocation4 + $0x60c] sm:$0xf0]  ;;  %v2836_v46 = vor.u32 %v3219_v31, %v2835_v30  ;;  %1351 = vmatpush.bf16.msra.mxu3 %v2468_v41  ;;  %1313 = vmatmul.bf16.vlgmr.msra.gmra.mxu0 %v3468_v55  ;;  %v3041_v30 = vld [vmem:[#allocation4 + $0x64] sm:$0xf] }
  0x39   :  { %v104_v45 = vld [vmem:[#allocation2 + $0x18] sm:$0xff]  ;;  %v3183_v49 = vld [vmem:[#allocation4 + $0x4cc] sm:$0xf0]  ;;  %v2852_v56 = vor.u32 %v3223_v39, %v2851_v38  ;;  %1357 = vmatpush.bf16.msrb.mxu0 %v2708_v42  ;;  %v2133_v31 = vld [vmem:[#allocation4 + $0x70] sm:$0xf0] }
  0x3a   :  { %v2691_v48 = vld [vmem:[#allocation4 + $0x4c0] sm:$0xf]  ;;  %v3215_v52 = vld [vmem:[#allocation4 + $0x5cc] sm:$0xf0]  ;;  %v3470_v57 = vpack.c.bf16 %v104_v45, %v104_v45  ;;  %1370 = vmatpush.bf16.msrb.mxu1 %v2836_v46  ;;  %1339 = vmatmul.bf16.vlgmr.msra.gmra.mxu2 %v3466_v51  ;;  %v2261_v36 = vld [vmem:[#allocation4 + $0x170] sm:$0xf0]  ;;  %v2136_v38 = vor.u32 %v3041_v30, %v2133_v31  ;;  %v3478_v45 = vpack.c.bf16 %v107_v32, %v107_v32 }
  0x3b   :  { %v2819_v50 = vld [vmem:[#allocation4 + $0x5c0] sm:$0xf]  ;;  %v102_v58 = vld [vmem:[#allocation2 + $0x8] sm:$0xff]  ;;  %v2692_v60 = vor.u32 %v3183_v49, %v2691_v48  ;;  %1390 = vmatpush.bf16.msrb.mxu2 %v2852_v56  ;;  %v2264_v46 = vor.u32 %v3073_v35, %v2261_v36  ;;  %v3069_v48 = vld [vmem:[#allocation4 + $0x144] sm:$0xf] }
  0x3c   :  { %1396 = vmatpush.bf16.msrb.mxu3 %v2200_v47  ;;  %v2820_v63 = vor.u32 %v3215_v52, %v2819_v50  ;;  %v2675_v1 = vld [vmem:[#allocation4 + $0x4a0] sm:$0xf]  ;;  %v3179_v2 = vld [vmem:[#allocation4 + $0x4ac] sm:$0xf0]  ;;  %v3474_v7 = vpack.c.bf16 %v102_v58, %v102_v58  ;;  %v2245_v49 = vld [vmem:[#allocation4 + $0x150] sm:$0xf0]  ;;  %v2120_v52 = vor.u32 %v3037_v43, %v2117_v44 }
  0x3d   :  { %v2803_v3 = vld [vmem:[#allocation4 + $0x5a0] sm:$0xf]  ;;  %v3211_v4 = vld [vmem:[#allocation4 + $0x5ac] sm:$0xf0]  ;;  %1352 = vmatmul.bf16.vlgmr.msra.gmra.mxu3 %v3470_v57  ;;  %1358 = vmatpush.bf16.msrb.mxu0 %v2692_v60  ;;  %v2676_v9 = vor.u32 %v3179_v2, %v2675_v1  ;;  %v2101_v60 = vld [vmem:[#allocation4 + $0x30] sm:$0xf0]  ;;  %v2248_v61 = vor.u32 %v3069_v48, %v2245_v49 }
  0x3e   :  { %1371 = vmatpush.bf16.msrb.mxu1 %v2820_v63  ;;  %v2804_v12 = vor.u32 %v3211_v4, %v2803_v3  ;;  %v2659_v14 = vld [vmem:[#allocation4 + $0x480] sm:$0xf]  ;;  %v3175_v15 = vld [vmem:[#allocation4 + $0x48c] sm:$0xf0]  ;;  %v3065_v63 = vld [vmem:[#allocation4 + $0x124] sm:$0xf] }
  0x3f   :  { %1409 = vmatpush.bf16.msra.mxu2 %v2328_v59  ;;  %v2787_v16 = vld [vmem:[#allocation4 + $0x580] sm:$0xf]  ;;  %1326 = vmatmul.bf16.vlgmr.msra.gmra.mxu1 %v3474_v7  ;;  %v3207_v17 = vld [vmem:[#allocation4 + $0x58c] sm:$0xf0]  ;;  %v2660_v21 = vor.u32 %v3175_v15, %v2659_v14  ;;  %v3033_v59 = vld [vmem:[#allocation4 + $0x24] sm:$0xf] }
  0x40   :  { %1397 = vmatpush.bf16.msrb.mxu3 %v2184_v0  ;;  %v2788_v24 = vor.u32 %v3207_v17, %v2787_v16  ;;  %v2643_v26 = vld [vmem:[#allocation4 + $0x460] sm:$0xf]  ;;  %v3171_v27 = vld [vmem:[#allocation4 + $0x46c] sm:$0xf0]  ;;  %v2229_v0 = vld [vmem:[#allocation4 + $0x130] sm:$0xf0]  ;;  %v2104_v3 = vor.u32 %v3033_v59, %v2101_v60 }
  0x41   :  { %1359 = vmatpush.bf16.msrb.mxu0 %v2676_v9  ;;  %v2771_v28 = vld [vmem:[#allocation4 + $0x560] sm:$0xf]  ;;  %v3203_v29 = vld [vmem:[#allocation4 + $0x56c] sm:$0xf0]  ;;  %v2644_v34 = vor.u32 %v3171_v27, %v2643_v26  ;;  %v2085_v9 = vld [vmem:[#allocation4 + $0x10] sm:$0xf0]  ;;  %v2232_v14 = vor.u32 %v3065_v63, %v2229_v0 }
  0x42   :  { %1372 = vmatpush.bf16.msrb.mxu1 %v2804_v12  ;;  %v2772_v37 = vor.u32 %v3203_v29, %v2771_v28  ;;  %v2627_v39 = vld [vmem:[#allocation4 + $0x440] sm:$0xf]  ;;  %v3167_v40 = vld [vmem:[#allocation4 + $0x44c] sm:$0xf0]  ;;  %v3121_v10 = vld [vmem:[#allocation4 + $0x2e4] sm:$0xf] }
  0x43   :  { %1410 = vmatpush.bf16.msra.mxu2 %v2312_v8  ;;  %v2755_v41 = vld [vmem:[#allocation4 + $0x540] sm:$0xf]  ;;  %v3199_v42 = vld [vmem:[#allocation4 + $0x54c] sm:$0xf0]  ;;  %v2628_v47 = vor.u32 %v3167_v40, %v2627_v39  ;;  %v3029_v8 = vld [vmem:[#allocation4 + $0x4] sm:$0xf] }
  0x44   :  { %1398 = vmatpush.bf16.msrb.mxu3 %v2168_v13  ;;  %v2756_v50 = vor.u32 %v3199_v42, %v2755_v41  ;;  %v2611_v53 = vld [vmem:[#allocation4 + $0x420] sm:$0xf]  ;;  %v3163_v54 = vld [vmem:[#allocation4 + $0x42c] sm:$0xf0]  ;;  %v2453_v11 = vld [vmem:[#allocation4 + $0x2f0] sm:$0xf0] }
  0x45   :  { %1360 = vmatpush.bf16.msrb.mxu0 %v2660_v21  ;;  %v2739_v56 = vld [vmem:[#allocation4 + $0x520] sm:$0xf]  ;;  %v3195_v58 = vld [vmem:[#allocation4 + $0x52c] sm:$0xf0]  ;;  %v2612_v62 = vor.u32 %v3163_v54, %v2611_v53  ;;  %v3153_v12 = vld [vmem:[#allocation4 + $0x3e4] sm:$0xf] }
  0x46   :  { %1373 = vmatpush.bf16.msrb.mxu1 %v2788_v24  ;;  %v2595_v1 = vld [vmem:[#allocation4 + $0x400] sm:$0xf]  ;;  %v2740_v2 = vor.u32 %v3195_v58, %v2739_v56  ;;  %v3159_v4 = vld [vmem:[#allocation4 + $0x40c] sm:$0xf0]  ;;  %v2581_v13 = vld [vmem:[#allocation4 + $0x3f0] sm:$0xf0]  ;;  %v2456_v24 = vor.u32 %v3121_v10, %v2453_v11 }
  0x47   :  { %1411 = vmatpush.bf16.msra.mxu2 %v2296_v20  ;;  %v2723_v5 = vld [vmem:[#allocation4 + $0x500] sm:$0xf]  ;;  %v3191_v6 = vld [vmem:[#allocation4 + $0x50c] sm:$0xf0]  ;;  %v2596_v15 = vor.u32 %v3159_v4, %v2595_v1  ;;  %v3185_v16 = vld [vmem:[#allocation4 + $0x4e4] sm:$0xf]  ;;  %v2088_v20 = vor.u32 %v3029_v8, %v2085_v9 }
  0x48   :  { %1399 = vmatpush.bf16.msrb.mxu3 %v2152_v25  ;;  %v2709_v17 = vld [vmem:[#allocation4 + $0x4f0] sm:$0xf0]  ;;  %v105_v18 = vld [vmem:[#allocation2 + $0x20] sm:$0xff]  ;;  %v2724_v19 = vor.u32 %v3191_v6, %v2723_v5  ;;  %v3061_v21 = vld [vmem:[#allocation4 + $0x104] sm:$0xf]  ;;  %v2584_v25 = vor.u32 %v3153_v12, %v2581_v13 }
  0x49   :  { %1361 = vmatpush.bf16.msrb.mxu0 %v2644_v34  ;;  %v2213_v22 = vld [vmem:[#allocation4 + $0x110] sm:$0xf0]  ;;  %v3217_v26 = vld [vmem:[#allocation4 + $0x5e4] sm:$0xf]  ;;  %v2712_v29 = vor.u32 %v3185_v16, %v2709_v17  ;;  %v3482_v30 = vpack.c.bf16 %v105_v18, %v105_v18 }
  0x4a   :  { %1374 = vmatpush.bf16.msrb.mxu1 %v2772_v37  ;;  %2865 = vmatmul.msk.bf16.vlgmr.msrb.gmra.mxu2 %vm1301_vm0, %v3478_v45  ;;  %v106_v23 = vld [vmem:[#allocation2 + $0x28] sm:$0xff]  ;;  %v3117_v28 = vld [vmem:[#allocation4 + $0x2c4] sm:$0xf]  ;;  %v2216_v34 = vor.u32 %v3061_v21, %v2213_v22 }
  0x4b   :  { %1412 = vmatpush.bf16.msra.mxu2 %v2280_v33  ;;  %v2837_v27 = vld [vmem:[#allocation4 + $0x5f0] sm:$0xf0]  ;;  %v3149_v32 = vld [vmem:[#allocation4 + $0x3c4] sm:$0xf]  ;;  %v3484_v35 = vpack.c.bf16 %v106_v23, %v106_v23 }
  0x4c   :  { %1400 = vmatpush.bf16.msrb.mxu3 %v2136_v38  ;;  %v2437_v31 = vld [vmem:[#allocation4 + $0x2d0] sm:$0xf0]  ;;  %v3181_v36 = vld [vmem:[#allocation4 + $0x4c4] sm:$0xf]  ;;  %v2840_v38 = vor.u32 %v3217_v26, %v2837_v27 }
  0x4d   :  { %1362 = vmatpush.bf16.msrb.mxu0 %v2628_v47  ;;  %v2565_v33 = vld [vmem:[#allocation4 + $0x3d0] sm:$0xf0]  ;;  %v2440_v39 = vor.u32 %v3117_v28, %v2437_v31  ;;  %v3213_v41 = vld [vmem:[#allocation4 + $0x5c4] sm:$0xf] }
  0x4e   :  { %1375 = vmatpush.bf16.msrb.mxu1 %v2756_v50  ;;  %v2693_v37 = vld [vmem:[#allocation4 + $0x4d0] sm:$0xf0]  ;;  %v2568_v40 = vor.u32 %v3149_v32, %v2565_v33  ;;  %v3113_v43 = vld [vmem:[#allocation4 + $0x2a4] sm:$0xf] }
  0x4f   :  { %1413 = vmatpush.bf16.msra.mxu2 %v2264_v46  ;;  %v2821_v42 = vld [vmem:[#allocation4 + $0x5d0] sm:$0xf0]  ;;  %v2696_v44 = vor.u32 %v3181_v36, %v2693_v37  ;;  %v3145_v47 = vld [vmem:[#allocation4 + $0x3a4] sm:$0xf] }
  0x50   :  { %1401 = vmatpush.bf16.msrb.mxu3 %v2120_v52  ;;  %v2421_v46 = vld [vmem:[#allocation4 + $0x2b0] sm:$0xf0]  ;;  %v3177_v49 = vld [vmem:[#allocation4 + $0x4a4] sm:$0xf]  ;;  %v2824_v52 = vor.u32 %v3213_v41, %v2821_v42 }
  0x51   :  { %1363 = vmatpush.bf16.msrb.mxu0 %v2612_v62  ;;  %v2549_v48 = vld [vmem:[#allocation4 + $0x3b0] sm:$0xf0]  ;;  %v2424_v53 = vor.u32 %v3113_v43, %v2421_v46  ;;  %v3209_v56 = vld [vmem:[#allocation4 + $0x5a4] sm:$0xf] }
  0x52   :  { %1376 = vmatpush.bf16.msrb.mxu1 %v2740_v2  ;;  %v2677_v50 = vld [vmem:[#allocation4 + $0x4b0] sm:$0xf0]  ;;  %v2552_v54 = vor.u32 %v3145_v47, %v2549_v48  ;;  %v3109_v59 = vld [vmem:[#allocation4 + $0x284] sm:$0xf] }
  0x53   :  { %1414 = vmatpush.bf16.msra.mxu2 %v2248_v61  ;;  %v2805_v58 = vld [vmem:[#allocation4 + $0x5b0] sm:$0xf0]  ;;  %v2680_v60 = vor.u32 %v3177_v49, %v2677_v50  ;;  %v3141_v62 = vld [vmem:[#allocation4 + $0x384] sm:$0xf] }
  0x54   :  { %1402 = vmatpush.bf16.msrb.mxu3 %v2104_v3  ;;  %v2405_v61 = vld [vmem:[#allocation4 + $0x290] sm:$0xf0]  ;;  %v3173_v0 = vld [vmem:[#allocation4 + $0x484] sm:$0xf]  ;;  %v2808_v2 = vor.u32 %v3209_v56, %v2805_v58  ;;  %v2203_v56 = vld [vmem:[#allocation4 + $0xe8] sm:$0xf] }
  0x55   :  { %1364 = vmatpush.bf16.msrb.mxu0 %v2596_v15  ;;  %v2533_v63 = vld [vmem:[#allocation4 + $0x390] sm:$0xf0]  ;;  %v2408_v3 = vor.u32 %v3109_v59, %v2405_v61  ;;  %v3205_v5 = vld [vmem:[#allocation4 + $0x584] sm:$0xf]  ;;  %v3060_v58 = vld [vmem:[#allocation4 + $0xf4] sm:$0xf0] }
  0x56   :  { %1377 = vmatpush.bf16.msrb.mxu1 %v2724_v19  ;;  %v2661_v1 = vld [vmem:[#allocation4 + $0x490] sm:$0xf0]  ;;  %v2536_v4 = vor.u32 %v3141_v62, %v2533_v63  ;;  %v3105_v8 = vld [vmem:[#allocation4 + $0x264] sm:$0xf]  ;;  %v2331_v59 = vld [vmem:[#allocation4 + $0x1e8] sm:$0xf] }
  0x57   :  { %1415 = vmatpush.bf16.msra.mxu2 %v2232_v14  ;;  %v2789_v6 = vld [vmem:[#allocation4 + $0x590] sm:$0xf0]  ;;  %v2664_v9 = vor.u32 %v3173_v0, %v2661_v1  ;;  %v3137_v11 = vld [vmem:[#allocation4 + $0x364] sm:$0xf]  ;;  %v3092_v61 = vld [vmem:[#allocation4 + $0x1f4] sm:$0xf0] }
  0x58   :  { %1403 = vmatpush.bf16.msrb.mxu3 %v2088_v20  ;;  %1365 = vmatmul.bf16.vlgmr.msrb.gmra.mxu0 %v3482_v30  ;;  %v2389_v10 = vld [vmem:[#allocation4 + $0x270] sm:$0xf0]  ;;  %v3169_v13 = vld [vmem:[#allocation4 + $0x464] sm:$0xf]  ;;  %v2792_v15 = vor.u32 %v3205_v5, %v2789_v6  ;;  %v2204_v6 = vor.u32 %v3060_v58, %v2203_v56  ;;  %v3044_v56 = vld [vmem:[#allocation4 + $0x74] sm:$0xf0] }
  0x59   :  { %1422 = vmatpush.bf16.msra.mxu0 %v2456_v24  ;;  %1378 = vmatmul.bf16.vlgmr.msrb.gmra.mxu1 %v3484_v35  ;;  %v2517_v12 = vld [vmem:[#allocation4 + $0x370] sm:$0xf0]  ;;  %v2392_v16 = vor.u32 %v3105_v8, %v2389_v10  ;;  %v3201_v18 = vld [vmem:[#allocation4 + $0x564] sm:$0xf]  ;;  %v3124_v8 = vld [vmem:[#allocation4 + $0x2f4] sm:$0xf0] }
  0x5a   :  { %1435 = vmatpush.bf16.msra.mxu1 %v2584_v25  ;;  %v2645_v14 = vld [vmem:[#allocation4 + $0x470] sm:$0xf0]  ;;  %v2520_v17 = vor.u32 %v3137_v11, %v2517_v12  ;;  %v3101_v20 = vld [vmem:[#allocation4 + $0x244] sm:$0xf]  ;;  %v3156_v10 = vld [vmem:[#allocation4 + $0x3f4] sm:$0xf0]  ;;  %v2332_v11 = vor.u32 %v3092_v61, %v2331_v59 }
  0x5b   :  { %1416 = vmatpush.bf16.msra.mxu2 %v2216_v34  ;;  %1404 = vmatmul.bf16.vlgmr.msrb.gmra.mxu3 %v3468_v55  ;;  %v2773_v19 = vld [vmem:[#allocation4 + $0x570] sm:$0xf0]  ;;  %v2648_v21 = vor.u32 %v3169_v13, %v2645_v14  ;;  %v3133_v23 = vld [vmem:[#allocation4 + $0x344] sm:$0xf]  ;;  %v2187_v13 = vld [vmem:[#allocation4 + $0xc8] sm:$0xf] }
  0x5c   :  { %1448 = vmatpush.bf16.msra.mxu3 %v2712_v29  ;;  %v2373_v22 = vld [vmem:[#allocation4 + $0x250] sm:$0xf0]  ;;  %v3165_v25 = vld [vmem:[#allocation4 + $0x444] sm:$0xf]  ;;  %v2776_v27 = vor.u32 %v3201_v18, %v2773_v19  ;;  %v3056_v14 = vld [vmem:[#allocation4 + $0xd4] sm:$0xf0] }
  0x5d   :  { %1423 = vmatpush.bf16.msra.mxu0 %v2440_v39  ;;  %v2501_v24 = vld [vmem:[#allocation4 + $0x350] sm:$0xf0]  ;;  %v2376_v28 = vor.u32 %v3101_v20, %v2373_v22  ;;  %v3197_v31 = vld [vmem:[#allocation4 + $0x544] sm:$0xf]  ;;  %v2443_v20 = vld [vmem:[#allocation4 + $0x2c8] sm:$0xf] }
  0x5e   :  { %1436 = vmatpush.bf16.msra.mxu1 %v2568_v40  ;;  %1417 = vmatmul.bf16.vlgmr.msra.gmra.mxu2 %v3474_v7  ;;  %v2629_v26 = vld [vmem:[#allocation4 + $0x450] sm:$0xf0]  ;;  %v2504_v29 = vor.u32 %v3133_v23, %v2501_v24  ;;  %v3097_v33 = vld [vmem:[#allocation4 + $0x224] sm:$0xf]  ;;  %v3120_v22 = vld [vmem:[#allocation4 + $0x2d4] sm:$0xf0] }
  0x5f   :  { %1461 = vmatpush.bf16.msrb.mxu2 %v2840_v38  ;;  %v2757_v32 = vld [vmem:[#allocation4 + $0x550] sm:$0xf0]  ;;  %v2632_v34 = vor.u32 %v3165_v25, %v2629_v26  ;;  %v3129_v37 = vld [vmem:[#allocation4 + $0x324] sm:$0xf]  ;;  %v2571_v23 = vld [vmem:[#allocation4 + $0x3c8] sm:$0xf] }
  0x60   :  { %1449 = vmatpush.bf16.msra.mxu3 %v2696_v44  ;;  %v2357_v36 = vld [vmem:[#allocation4 + $0x230] sm:$0xf0]  ;;  %v3161_v39 = vld [vmem:[#allocation4 + $0x424] sm:$0xf]  ;;  %v2760_v41 = vor.u32 %v3197_v31, %v2757_v32  ;;  %v3152_v24 = vld [vmem:[#allocation4 + $0x3d4] sm:$0xf0]  ;;  %v2444_v31 = vor.u32 %v3120_v22, %v2443_v20 }
  0x61   :  { %1424 = vmatpush.bf16.msra.mxu0 %v2424_v53  ;;  %v2485_v38 = vld [vmem:[#allocation4 + $0x330] sm:$0xf0]  ;;  %v3193_v42 = vld [vmem:[#allocation4 + $0x524] sm:$0xf]  ;;  %v2360_v44 = vor.u32 %v3097_v33, %v2357_v36  ;;  %v2171_v26 = vld [vmem:[#allocation4 + $0xa8] sm:$0xf]  ;;  %v2572_v32 = vor.u32 %v3152_v24, %v2571_v23 }
  0x62   :  { %1437 = vmatpush.bf16.msra.mxu1 %v2552_v54  ;;  %v2613_v40 = vld [vmem:[#allocation4 + $0x430] sm:$0xf0]  ;;  %v2488_v46 = vor.u32 %v3129_v37, %v2485_v38  ;;  %v3093_v47 = vld [vmem:[#allocation4 + $0x204] sm:$0xf]  ;;  %v2427_v33 = vld [vmem:[#allocation4 + $0x2a8] sm:$0xf] }
  0x63   :  { %1462 = vmatpush.bf16.msrb.mxu2 %v2824_v52  ;;  %v2741_v43 = vld [vmem:[#allocation4 + $0x530] sm:$0xf0]  ;;  %v3125_v49 = vld [vmem:[#allocation4 + $0x304] sm:$0xf]  ;;  %v2616_v50 = vor.u32 %v3161_v39, %v2613_v40  ;;  %v3116_v36 = vld [vmem:[#allocation4 + $0x2b4] sm:$0xf0] }
  0x64   :  { %1450 = vmatpush.bf16.msra.mxu3 %v2680_v60  ;;  %v2341_v48 = vld [vmem:[#allocation4 + $0x210] sm:$0xf0]  ;;  %v3157_v53 = vld [vmem:[#allocation4 + $0x404] sm:$0xf]  ;;  %v2744_v60 = vor.u32 %v3193_v42, %v2741_v43  ;;  %v2555_v37 = vld [vmem:[#allocation4 + $0x3a8] sm:$0xf] }
  0x65   :  { %1425 = vmatpush.bf16.msra.mxu0 %v2408_v3  ;;  %v2469_v52 = vld [vmem:[#allocation4 + $0x310] sm:$0xf0]  ;;  %v3221_v62 = vld [vmem:[#allocation4 + $0x604] sm:$0xf]  ;;  %v2344_v0 = vor.u32 %v3093_v47, %v2341_v48  ;;  %v3148_v38 = vld [vmem:[#allocation4 + $0x3b4] sm:$0xf0] }
  0x66   :  { %1438 = vmatpush.bf16.msra.mxu1 %v2536_v4  ;;  %v2597_v54 = vld [vmem:[#allocation4 + $0x410] sm:$0xf0]  ;;  %v2472_v1 = vor.u32 %v3125_v49, %v2469_v52  ;;  %v2459_v4 = vld [vmem:[#allocation4 + $0x2e8] sm:$0xf]  ;;  %v3080_v43 = vld [vmem:[#allocation4 + $0x194] sm:$0xf0] }
  0x67   :  { %1463 = vmatpush.bf16.msrb.mxu2 %v2808_v2  ;;  %v2853_v63 = vld [vmem:[#allocation4 + $0x610] sm:$0xf0]  ;;  %v3189_v2 = vld [vmem:[#allocation4 + $0x504] sm:$0xf]  ;;  %v2600_v5 = vor.u32 %v3157_v53, %v2597_v54  ;;  %v2460_v18 = vor.u32 %v3124_v8, %v2459_v4  ;;  %v2155_v40 = vld [vmem:[#allocation4 + $0x88] sm:$0xf] }
  0x68   :  { %1451 = vmatpush.bf16.msra.mxu3 %v2664_v9  ;;  %v2725_v3 = vld [vmem:[#allocation4 + $0x510] sm:$0xf0]  ;;  %v2587_v9 = vld [vmem:[#allocation4 + $0x3e8] sm:$0xf]  ;;  %v2856_v12 = vor.u32 %v3221_v62, %v2853_v63  ;;  %v3112_v49 = vld [vmem:[#allocation4 + $0x294] sm:$0xf0] }
  0x69   :  { %1426 = vmatpush.bf16.msra.mxu0 %v2392_v16  ;;  %v2315_v16 = vld [vmem:[#allocation4 + $0x1c8] sm:$0xf]  ;;  %v2588_v19 = vor.u32 %v3156_v10, %v2587_v9  ;;  %v3144_v52 = vld [vmem:[#allocation4 + $0x394] sm:$0xf0] }
  0x6a   :  { %1439 = vmatpush.bf16.msra.mxu1 %v2520_v17  ;;  %v3088_v17 = vld [vmem:[#allocation4 + $0x1d4] sm:$0xf0]  ;;  %v2283_v42 = vld [vmem:[#allocation4 + $0x188] sm:$0xf] }
  0x6b   :  { %1464 = vmatpush.bf16.msrb.mxu2 %v2792_v15  ;;  %v2728_v15 = vor.u32 %v3189_v2, %v2725_v3  ;;  %v2316_v25 = vor.u32 %v3088_v17, %v2315_v16  ;;  %v2411_v47 = vld [vmem:[#allocation4 + $0x288] sm:$0xf]  ;;  %v2284_v53 = vor.u32 %v3080_v43, %v2283_v42  ;;  %v3076_v59 = vld [vmem:[#allocation4 + $0x174] sm:$0xf0] }
  0x6c   :  { %1452 = vmatpush.bf16.msra.mxu3 %v2648_v21  ;;  %v2188_v21 = vor.u32 %v3056_v14, %v2187_v13  ;;  %v2139_v54 = vld [vmem:[#allocation4 + $0x68] sm:$0xf]  ;;  %v3140_v2 = vld [vmem:[#allocation4 + $0x374] sm:$0xf0] }
  0x6d   :  { %1427 = vmatpush.bf16.msra.mxu0 %v2376_v28  ;;  %v2299_v28 = vld [vmem:[#allocation4 + $0x1a8] sm:$0xf]  ;;  %v2140_v63 = vor.u32 %v3044_v56, %v2139_v54  ;;  %v3072_v8 = vld [vmem:[#allocation4 + $0x154] sm:$0xf0] }
  0x6e   :  { %1440 = vmatpush.bf16.msra.mxu1 %v2504_v29  ;;  %v3084_v29 = vld [vmem:[#allocation4 + $0x1b4] sm:$0xf0]  ;;  %v2267_v58 = vld [vmem:[#allocation4 + $0x168] sm:$0xf] }
  0x6f   :  { %1465 = vmatpush.bf16.msrb.mxu2 %v2776_v27  ;;  %v3052_v27 = vld [vmem:[#allocation4 + $0xb4] sm:$0xf0]  ;;  %v2300_v39 = vor.u32 %v3084_v29, %v2299_v28  ;;  %v2395_v62 = vld [vmem:[#allocation4 + $0x268] sm:$0xf]  ;;  %v2268_v3 = vor.u32 %v3076_v59, %v2267_v58 }
  0x70   :  { %1453 = vmatpush.bf16.msra.mxu3 %v2632_v34  ;;  %v2172_v34 = vor.u32 %v3052_v27, %v2171_v26  ;;  %v2123_v4 = vld [vmem:[#allocation4 + $0x48] sm:$0xf]  ;;  %v3104_v13 = vld [vmem:[#allocation4 + $0x254] sm:$0xf0] }
  0x71   :  { %1428 = vmatpush.bf16.msra.mxu0 %v2360_v44  ;;  %v2428_v44 = vor.u32 %v3116_v36, %v2427_v33  ;;  %v2507_v14 = vld [vmem:[#allocation4 + $0x348] sm:$0xf]  ;;  %v3068_v20 = vld [vmem:[#allocation4 + $0x134] sm:$0xf0] }
  0x72   :  { %1441 = vmatpush.bf16.msra.mxu1 %v2488_v46  ;;  %v2556_v46 = vor.u32 %v3148_v38, %v2555_v37  ;;  %v2107_v17 = vld [vmem:[#allocation4 + $0x28] sm:$0xf]  ;;  %v3100_v24 = vld [vmem:[#allocation4 + $0x234] sm:$0xf0] }
  0x73   :  { %1466 = vmatpush.bf16.msrb.mxu2 %v2760_v41  ;;  %v3048_v41 = vld [vmem:[#allocation4 + $0x94] sm:$0xf0]  ;;  %v2363_v23 = vld [vmem:[#allocation4 + $0x228] sm:$0xf] }
  0x74   :  { %1454 = vmatpush.bf16.msra.mxu3 %v2616_v50  ;;  %v2156_v48 = vor.u32 %v3048_v41, %v2155_v40  ;;  %v2539_v50 = vld [vmem:[#allocation4 + $0x388] sm:$0xf]  ;;  %v3132_v27 = vld [vmem:[#allocation4 + $0x334] sm:$0xf0]  ;;  %v2364_v38 = vor.u32 %v3100_v24, %v2363_v23 }
  0x75   :  { %1429 = vmatpush.bf16.msra.mxu0 %v2344_v0  ;;  %v2540_v61 = vor.u32 %v3144_v52, %v2539_v50  ;;  %v3108_v0 = vld [vmem:[#allocation4 + $0x274] sm:$0xf0]  ;;  %v2491_v26 = vld [vmem:[#allocation4 + $0x328] sm:$0xf]  ;;  %v2205_v50 = vld [vmem:[#allocation4 + $0xf8] sm:$0xf0] }
  0x76   :  { %1442 = vmatpush.bf16.msra.mxu1 %v2472_v1  ;;  %v2523_v1 = vld [vmem:[#allocation4 + $0x368] sm:$0xf]  ;;  %v2396_v9 = vor.u32 %v3108_v0, %v2395_v62  ;;  %v3064_v33 = vld [vmem:[#allocation4 + $0x114] sm:$0xf0] }
  0x77   :  { %1467 = vmatpush.bf16.msrb.mxu2 %v2744_v60  ;;  %v2412_v60 = vor.u32 %v3112_v49, %v2411_v47  ;;  %v2524_v10 = vor.u32 %v3140_v2, %v2523_v1  ;;  %v2091_v28 = vld [vmem:[#allocation4 + $0x8] sm:$0xf]  ;;  %v3188_v36 = vld [vmem:[#allocation4 + $0x4f4] sm:$0xf0]  ;;  %v3058_v47 = vld [vmem:[#allocation4 + $0xec] sm:$0xf] }
  0x78   :  { %1455 = vmatpush.bf16.msra.mxu3 %v2600_v5  ;;  %1430 = vmatmul.bf16.vlgmr.msra.gmra.mxu0 %v3466_v51  ;;  %v3040_v5 = vld [vmem:[#allocation4 + $0x54] sm:$0xf0]  ;;  %v2843_v37 = vld [vmem:[#allocation4 + $0x5e8] sm:$0xf]  ;;  %v3090_v1 = vld [vmem:[#allocation4 + $0x1ec] sm:$0xf] }
  0x79   :  { %1481 = vmatpush.bf16.msrb.mxu0 %v2856_v12  ;;  %1443 = vmatmul.bf16.vlgmr.msra.gmra.mxu1 %v3470_v57  ;;  %v2124_v12 = vor.u32 %v3040_v5, %v2123_v4  ;;  %v3220_v40 = vld [vmem:[#allocation4 + $0x5f4] sm:$0xf0]  ;;  %v2347_v41 = vld [vmem:[#allocation4 + $0x208] sm:$0xf]  ;;  %v2333_v2 = vld [vmem:[#allocation4 + $0x1f8] sm:$0xf0] }
  0x7a   :  { %1487 = vmatpush.bf16.msrb.mxu1 %v2204_v6  ;;  %v2251_v6 = vld [vmem:[#allocation4 + $0x148] sm:$0xf]  ;;  %v3096_v42 = vld [vmem:[#allocation4 + $0x214] sm:$0xf0]  ;;  %v2844_v54 = vor.u32 %v3220_v40, %v2843_v37  ;;  %v3054_v4 = vld [vmem:[#allocation4 + $0xcc] sm:$0xf] }
  0x7b   :  { %1468 = vmatpush.bf16.msrb.mxu2 %v2728_v15  ;;  %1456 = vmatmul.bf16.vlgmr.msra.gmra.mxu3 %v3482_v30  ;;  %v3136_v15 = vld [vmem:[#allocation4 + $0x354] sm:$0xf0]  ;;  %v2252_v16 = vor.u32 %v3072_v8, %v2251_v6  ;;  %v2859_v52 = vld [vmem:[#allocation4 + $0x608] sm:$0xf]  ;;  %v2348_v59 = vor.u32 %v3096_v42, %v2347_v41  ;;  %v2189_v5 = vld [vmem:[#allocation4 + $0xd8] sm:$0xf0] }
  0x7c   :  { %1500 = vmatpush.bf16.msrb.mxu3 %v2332_v11  ;;  %v2379_v11 = vld [vmem:[#allocation4 + $0x248] sm:$0xf]  ;;  %v2508_v22 = vor.u32 %v3136_v15, %v2507_v14  ;;  %v3184_v58 = vld [vmem:[#allocation4 + $0x4d4] sm:$0xf0]  ;;  %v3086_v14 = vld [vmem:[#allocation4 + $0x1cc] sm:$0xf] }
  0x7d   :  { %1513 = vmatpush.bf16.msra.mxu0 %v2460_v18  ;;  %v3036_v18 = vld [vmem:[#allocation4 + $0x34] sm:$0xf0]  ;;  %v2699_v56 = vld [vmem:[#allocation4 + $0x4c8] sm:$0xf]  ;;  %v2317_v15 = vld [vmem:[#allocation4 + $0x1d8] sm:$0xf0] }
  0x7e   :  { %1488 = vmatpush.bf16.msrb.mxu1 %v2188_v21  ;;  %1469 = vmatmul.bf16.vlgmr.msrb.gmra.mxu2 %v3484_v35  ;;  %v2380_v21 = vor.u32 %v3104_v13, %v2379_v11  ;;  %v3216_v62 = vld [vmem:[#allocation4 + $0x5d4] sm:$0xf0]  ;;  %v2683_v8 = vld [vmem:[#allocation4 + $0x4a8] sm:$0xf]  ;;  %v2192_v13 = vor.u32 %v3054_v4, %v2189_v5  ;;  %v3078_v40 = vld [vmem:[#allocation4 + $0x18c] sm:$0xf] }
  0x7f   :  { %1526 = vmatpush.bf16.msra.mxu2 %v2588_v19  ;;  %v2235_v19 = vld [vmem:[#allocation4 + $0x128] sm:$0xf]  ;;  %v3208_v24 = vld [vmem:[#allocation4 + $0x594] sm:$0xf0]  ;;  %v2285_v41 = vld [vmem:[#allocation4 + $0x198] sm:$0xf0] }
  0x80   :  { %1501 = vmatpush.bf16.msrb.mxu3 %v2316_v25  ;;  %v2108_v25 = vor.u32 %v3036_v18, %v2107_v17  ;;  %v2236_v29 = vor.u32 %v3068_v20, %v2235_v19  ;;  %v2811_v11 = vld [vmem:[#allocation4 + $0x5a8] sm:$0xf]  ;;  %v3050_v17 = vld [vmem:[#allocation4 + $0xac] sm:$0xf]  ;;  %v2173_v18 = vld [vmem:[#allocation4 + $0xb8] sm:$0xf0] }
  0x81   :  { %1514 = vmatpush.bf16.msra.mxu0 %v2444_v31  ;;  %v3032_v31 = vld [vmem:[#allocation4 + $0x14] sm:$0xf0]  ;;  %v2667_v20 = vld [vmem:[#allocation4 + $0x488] sm:$0xf]  ;;  %v3070_v4 = vld [vmem:[#allocation4 + $0x14c] sm:$0xf] }
  0x82   :  { %1489 = vmatpush.bf16.msrb.mxu1 %v2172_v34  ;;  %v2715_v34 = vld [vmem:[#allocation4 + $0x4e8] sm:$0xf]  ;;  %v2092_v43 = vor.u32 %v3032_v31, %v2091_v28  ;;  %v2157_v31 = vld [vmem:[#allocation4 + $0x98] sm:$0xf0] }
  0x83   :  { %1527 = vmatpush.bf16.msra.mxu2 %v2572_v32  ;;  %v2219_v32 = vld [vmem:[#allocation4 + $0x108] sm:$0xf]  ;;  %v2716_v49 = vor.u32 %v3188_v36, %v2715_v34  ;;  %v3172_v34 = vld [vmem:[#allocation4 + $0x474] sm:$0xf0]  ;;  %v2253_v5 = vld [vmem:[#allocation4 + $0x158] sm:$0xf0] }
  0x84   :  { %1502 = vmatpush.bf16.msrb.mxu3 %v2300_v39  ;;  %v2492_v39 = vor.u32 %v3132_v27, %v2491_v26  ;;  %v2795_v23 = vld [vmem:[#allocation4 + $0x588] sm:$0xf]  ;;  %v3082_v26 = vld [vmem:[#allocation4 + $0x1ac] sm:$0xf]  ;;  %v2301_v27 = vld [vmem:[#allocation4 + $0x1b8] sm:$0xf0] }
  0x85   :  { %1515 = vmatpush.bf16.msra.mxu0 %v2428_v44  ;;  %v2475_v44 = vld [vmem:[#allocation4 + $0x308] sm:$0xf]  ;;  %v2304_v36 = vor.u32 %v3082_v26, %v2301_v27 }
  0x86   :  { %1490 = vmatpush.bf16.msrb.mxu1 %v2156_v48  ;;  %v2220_v48 = vor.u32 %v3064_v33, %v2219_v32  ;;  %v2796_v32 = vor.u32 %v3208_v24, %v2795_v23  ;;  %v2651_v33 = vld [vmem:[#allocation4 + $0x468] sm:$0xf]  ;;  %v3030_v24 = vld [vmem:[#allocation4 + $0xc] sm:$0xf] }
  0x87   :  { %1528 = vmatpush.bf16.msra.mxu2 %v2556_v46  ;;  %v3128_v46 = vld [vmem:[#allocation4 + $0x314] sm:$0xf0]  ;;  %v2779_v37 = vld [vmem:[#allocation4 + $0x568] sm:$0xf]  ;;  %v2652_v42 = vor.u32 %v3172_v34, %v2651_v33  ;;  %v3118_v33 = vld [vmem:[#allocation4 + $0x2cc] sm:$0xf] }
  0x88   :  { %1503 = vmatpush.bf16.msrb.mxu3 %v2284_v53  ;;  %2866 = vmatmul.msk.bf16.vlgmr.msrb.gmra.mxu0 %vm1301_vm0, %v3478_v45  ;;  %v3224_v53 = vld [vmem:[#allocation4 + $0x614] sm:$0xf0]  ;;  %v2445_v34 = vld [vmem:[#allocation4 + $0x2d8] sm:$0xf0] }
  0x89   :  { %1516 = vmatpush.bf16.msra.mxu0 %v2412_v60  ;;  %v2476_v60 = vor.u32 %v3128_v46, %v2475_v44  ;;  %v2860_v0 = vor.u32 %v3224_v53, %v2859_v52  ;;  %v2141_v44 = vld [vmem:[#allocation4 + $0x78] sm:$0xf0]  ;;  %v3200_v52 = vld [vmem:[#allocation4 + $0x554] sm:$0xf0] }
  0x8a   :  { %1491 = vmatpush.bf16.msrb.mxu1 %v2140_v63  ;;  %v2208_v63 = vor.u32 %v3058_v47, %v2205_v50  ;;  %v2635_v47 = vld [vmem:[#allocation4 + $0x448] sm:$0xf] }
  0x8b   :  { %1529 = vmatpush.bf16.msra.mxu2 %v2540_v61  ;;  %v2827_v61 = vld [vmem:[#allocation4 + $0x5c8] sm:$0xf] }
  0x8c   :  { %1504 = vmatpush.bf16.msrb.mxu3 %v2268_v3  ;;  %v2700_v3 = vor.u32 %v3184_v58, %v2699_v56  ;;  %v2828_v6 = vor.u32 %v3216_v62, %v2827_v61  ;;  %v2763_v50 = vld [vmem:[#allocation4 + $0x548] sm:$0xf]  ;;  %v2269_v56 = vld [vmem:[#allocation4 + $0x178] sm:$0xf0] }
  0x8d   :  { %1517 = vmatpush.bf16.msra.mxu0 %v2396_v9  ;;  %v3180_v9 = vld [vmem:[#allocation4 + $0x4b4] sm:$0xf0]  ;;  %v2764_v61 = vor.u32 %v3200_v52, %v2763_v50  ;;  %v2619_v62 = vld [vmem:[#allocation4 + $0x428] sm:$0xf]  ;;  %v3114_v50 = vld [vmem:[#allocation4 + $0x2ac] sm:$0xf] }
  0x8e   :  { %1492 = vmatpush.bf16.msrb.mxu1 %v2124_v12  ;;  %v3212_v12 = vld [vmem:[#allocation4 + $0x5b4] sm:$0xf0]  ;;  %v2429_v52 = vld [vmem:[#allocation4 + $0x2b8] sm:$0xf0] }
  0x8f   :  { %1530 = vmatpush.bf16.msra.mxu2 %v2524_v10  ;;  %v2336_v10 = vor.u32 %v3090_v1, %v2333_v2  ;;  %v2812_v19 = vor.u32 %v3212_v12, %v2811_v11  ;;  %v2747_v1 = vld [vmem:[#allocation4 + $0x528] sm:$0xf]  ;;  %v3196_v2 = vld [vmem:[#allocation4 + $0x534] sm:$0xf0] }
  0x90   :  { %1505 = vmatpush.bf16.msrb.mxu3 %v2252_v16  ;;  %v2684_v16 = vor.u32 %v3180_v9, %v2683_v8  ;;  %v3034_v8 = vld [vmem:[#allocation4 + $0x2c] sm:$0xf]  ;;  %v2109_v9 = vld [vmem:[#allocation4 + $0x38] sm:$0xf0]  ;;  %v2748_v11 = vor.u32 %v3196_v2, %v2747_v1  ;;  %v3160_v12 = vld [vmem:[#allocation4 + $0x414] sm:$0xf0] }
  0x91   :  { %1518 = vmatpush.bf16.msra.mxu0 %v2380_v21  ;;  %v3176_v21 = vld [vmem:[#allocation4 + $0x494] sm:$0xf0]  ;;  %v3110_v1 = vld [vmem:[#allocation4 + $0x28c] sm:$0xf]  ;;  %v2413_v2 = vld [vmem:[#allocation4 + $0x298] sm:$0xf0] }
  0x92   :  { %1493 = vmatpush.bf16.msrb.mxu1 %v2108_v25  ;;  %v2176_v25 = vor.u32 %v3050_v17, %v2173_v18  ;;  %v2668_v28 = vor.u32 %v3176_v21, %v2667_v20  ;;  %v2461_v17 = vld [vmem:[#allocation4 + $0x2f8] sm:$0xf0]  ;;  %v3154_v18 = vld [vmem:[#allocation4 + $0x3ec] sm:$0xf] }
  0x93   :  { %1531 = vmatpush.bf16.msra.mxu2 %v2508_v22  ;;  %v2320_v22 = vor.u32 %v3086_v14, %v2317_v15  ;;  %v3192_v14 = vld [vmem:[#allocation4 + $0x514] sm:$0xf0]  ;;  %v2256_v15 = vor.u32 %v3070_v4, %v2253_v5  ;;  %v2589_v20 = vld [vmem:[#allocation4 + $0x3f8] sm:$0xf0]  ;;  %v3066_v21 = vld [vmem:[#allocation4 + $0x12c] sm:$0xf] }
  0x94   :  { %1506 = vmatpush.bf16.msrb.mxu3 %v2236_v29  ;;  %v3046_v29 = vld [vmem:[#allocation4 + $0x8c] sm:$0xf]  ;;  %v2541_v5 = vld [vmem:[#allocation4 + $0x398] sm:$0xf0] }
  0x95   :  { %1519 = vmatpush.bf16.msra.mxu0 %v2364_v38  ;;  %v3204_v38 = vld [vmem:[#allocation4 + $0x574] sm:$0xf0]  ;;  %v3142_v4 = vld [vmem:[#allocation4 + $0x38c] sm:$0xf] }
  0x96   :  { %1494 = vmatpush.bf16.msrb.mxu1 %v2092_v43  ;;  %v3042_v43 = vld [vmem:[#allocation4 + $0x6c] sm:$0xf]  ;;  %v2780_v46 = vor.u32 %v3204_v38, %v2779_v37  ;;  %v2573_v38 = vld [vmem:[#allocation4 + $0x3d8] sm:$0xf0] }
  0x97   :  { %1532 = vmatpush.bf16.msra.mxu2 %v2492_v39  ;;  %v2160_v39 = vor.u32 %v3046_v29, %v2157_v31  ;;  %v2144_v53 = vor.u32 %v3042_v43, %v2141_v44  ;;  %v2717_v29 = vld [vmem:[#allocation4 + $0x4f8] sm:$0xf0]  ;;  %v2592_v31 = vor.u32 %v3154_v18, %v2589_v20  ;;  %v2448_v44 = vor.u32 %v3118_v33, %v2445_v34  ;;  %v3206_v20 = vld [vmem:[#allocation4 + $0x58c] sm:$0xf] }
  0x98   :  { %1507 = vmatpush.bf16.msrb.mxu3 %v2220_v48  ;;  %v3168_v48 = vld [vmem:[#allocation4 + $0x454] sm:$0xf0]  ;;  %v2845_v43 = vld [vmem:[#allocation4 + $0x5f8] sm:$0xf0]  ;;  %v3202_v33 = vld [vmem:[#allocation4 + $0x56c] sm:$0xf] }
  0x99   :  { %1520 = vmatpush.bf16.msra.mxu0 %v2348_v59  ;;  %1495 = vmatmul.bf16.vlgmr.msrb.gmra.mxu1 %v3468_v55  ;;  %v2636_v58 = vor.u32 %v3168_v48, %v2635_v47  ;;  %v3038_v59 = vld [vmem:[#allocation4 + $0x4c] sm:$0xf]  ;;  %v2701_v47 = vld [vmem:[#allocation4 + $0x4d8] sm:$0xf0] }
  0x9a   :  { %1539 = vmatpush.bf16.msra.mxu1 %v2716_v49  ;;  %v2288_v49 = vor.u32 %v3078_v40, %v2285_v41  ;;  %v2221_v40 = vld [vmem:[#allocation4 + $0x118] sm:$0xf0] }
  0x9b   :  { %1533 = vmatpush.bf16.msra.mxu2 %v2476_v60  ;;  %1508 = vmatmul.bf16.vlgmr.msrb.gmra.mxu3 %v3474_v7  ;;  %v2125_v60 = vld [vmem:[#allocation4 + $0x58] sm:$0xf0] }
  0x9c   :  { %1552 = vmatpush.bf16.msra.mxu3 %v2844_v54  ;;  %1521 = vmatmul.bf16.vlgmr.msra.gmra.mxu0 %v3466_v51  ;;  %v3074_v54 = vld [vmem:[#allocation4 + $0x16c] sm:$0xf]  ;;  %v2525_v18 = vld [vmem:[#allocation4 + $0x378] sm:$0xf0] }
  0x9d   :  { %1572 = vmatpush.bf16.msrb.mxu0 %v2860_v0  ;;  %v2272_v0 = vor.u32 %v3074_v54, %v2269_v56  ;;  %v3146_v54 = vld [vmem:[#allocation4 + $0x3ac] sm:$0xf]  ;;  %v2557_v56 = vld [vmem:[#allocation4 + $0x3b8] sm:$0xf0] }
  0x9e   :  { %1540 = vmatpush.bf16.msra.mxu1 %v2700_v3  ;;  %1534 = vmatmul.bf16.vlgmr.msra.gmra.mxu2 %v3470_v57  ;;  %v2128_v3 = vor.u32 %v3038_v59, %v2125_v60  ;;  %v3214_v59 = vld [vmem:[#allocation4 + $0x5cc] sm:$0xf]  ;;  %v2829_v60 = vld [vmem:[#allocation4 + $0x5d8] sm:$0xf0] }
  0x9f   :  { %1578 = vmatpush.bf16.msrb.mxu2 %v2208_v63  ;;  %v3164_v63 = vld [vmem:[#allocation4 + $0x434] sm:$0xf0]  ;;  %v2781_v34 = vld [vmem:[#allocation4 + $0x578] sm:$0xf0] }
  0xa0   :  { %1553 = vmatpush.bf16.msra.mxu3 %v2828_v6  ;;  %v2620_v6 = vor.u32 %v3164_v63, %v2619_v62  ;;  %v3178_v62 = vld [vmem:[#allocation4 + $0x4ac] sm:$0xf]  ;;  %v2685_v63 = vld [vmem:[#allocation4 + $0x4b8] sm:$0xf0] }
  0xa1   :  { %1591 = vmatpush.bf16.msra.mxu0 %v2336_v10  ;;  %v2603_v10 = vld [vmem:[#allocation4 + $0x408] sm:$0xf] }
  0xa2   :  { %1541 = vmatpush.bf16.msra.mxu1 %v2684_v16  ;;  %v3122_v16 = vld [vmem:[#allocation4 + $0x2ec] sm:$0xf]  ;;  %v2604_v23 = vor.u32 %v3160_v12, %v2603_v10  ;;  %v2416_v10 = vor.u32 %v3110_v1, %v2413_v2  ;;  %v2669_v12 = vld [vmem:[#allocation4 + $0x498] sm:$0xf0] }
  0xa3   :  { %1579 = vmatpush.bf16.msrb.mxu2 %v2192_v13  ;;  %v2731_v13 = vld [vmem:[#allocation4 + $0x508] sm:$0xf]  ;;  %v2464_v27 = vor.u32 %v3122_v16, %v2461_v17  ;;  %v3138_v17 = vld [vmem:[#allocation4 + $0x36c] sm:$0xf]  ;;  %v2861_v2 = vld [vmem:[#allocation4 + $0x618] sm:$0xf0] }
  0xa4   :  { %1554 = vmatpush.bf16.msra.mxu3 %v2812_v19  ;;  %v2112_v19 = vor.u32 %v3034_v8, %v2109_v9  ;;  %v2732_v26 = vor.u32 %v3192_v14, %v2731_v13  ;;  %v3210_v8 = vld [vmem:[#allocation4 + $0x5ac] sm:$0xf]  ;;  %v2813_v9 = vld [vmem:[#allocation4 + $0x5b8] sm:$0xf0]  ;;  %v2544_v13 = vor.u32 %v3142_v4, %v2541_v5 }
  0xa5   :  { %1592 = vmatpush.bf16.msra.mxu0 %v2320_v22  ;;  %v2237_v22 = vld [vmem:[#allocation4 + $0x138] sm:$0xf0]  ;;  %v3106_v14 = vld [vmem:[#allocation4 + $0x26c] sm:$0xf]  ;;  %v2816_v16 = vor.u32 %v3210_v8, %v2813_v9 }
  0xa6   :  { %1542 = vmatpush.bf16.msra.mxu1 %v2668_v28  ;;  %v3186_v28 = vld [vmem:[#allocation4 + $0x4ec] sm:$0xf] }
  0xa7   :  { %1580 = vmatpush.bf16.msrb.mxu2 %v2176_v25  ;;  %v2093_v25 = vld [vmem:[#allocation4 + $0x18] sm:$0xf0]  ;;  %v2720_v41 = vor.u32 %v3186_v28, %v2717_v29  ;;  %v3134_v29 = vld [vmem:[#allocation4 + $0x34c] sm:$0xf] }
  0xa8   :  { %1555 = vmatpush.bf16.msra.mxu3 %v2796_v32  ;;  %v2240_v32 = vor.u32 %v3066_v21, %v2237_v22  ;;  %v2096_v37 = vor.u32 %v3030_v24, %v2093_v25  ;;  %v2797_v21 = vld [vmem:[#allocation4 + $0x598] sm:$0xf0]  ;;  %v3102_v25 = vld [vmem:[#allocation4 + $0x24c] sm:$0xf] }
  0xa9   :  { %1593 = vmatpush.bf16.msra.mxu0 %v2304_v36  ;;  %v3150_v36 = vld [vmem:[#allocation4 + $0x3cc] sm:$0xf]  ;;  %v2653_v24 = vld [vmem:[#allocation4 + $0x478] sm:$0xf0] }
  0xaa   :  { %1543 = vmatpush.bf16.msra.mxu1 %v2652_v42  ;;  %v3218_v42 = vld [vmem:[#allocation4 + $0x5ec] sm:$0xf]  ;;  %v2576_v48 = vor.u32 %v3150_v36, %v2573_v38 }
  0xab   :  { %1581 = vmatpush.bf16.msrb.mxu2 %v2160_v39  ;;  %v3062_v39 = vld [vmem:[#allocation4 + $0x10c] sm:$0xf] }
  0xac   :  { %1556 = vmatpush.bf16.msra.mxu3 %v2780_v46  ;;  %2867 = vmatmul.msk.bf16.vlgmr.msrb.gmra.mxu0 %vm1301_vm0, %v3478_v45  ;;  %v3182_v46 = vld [vmem:[#allocation4 + $0x4cc] sm:$0xf] }
  0xad   :  { %1594 = vmatpush.bf16.msra.mxu0 %v2288_v49  ;;  %v2224_v49 = vor.u32 %v3062_v39, %v2221_v40  ;;  %v3166_v38 = vld [vmem:[#allocation4 + $0x44c] sm:$0xf]  ;;  %v2637_v39 = vld [vmem:[#allocation4 + $0x458] sm:$0xf0] }
  0xae   :  { %1544 = vmatpush.bf16.msra.mxu1 %v2636_v58  ;;  %v2704_v58 = vor.u32 %v3182_v46, %v2701_v47  ;;  %v3130_v46 = vld [vmem:[#allocation4 + $0x32c] sm:$0xf]  ;;  %v2493_v47 = vld [vmem:[#allocation4 + $0x338] sm:$0xf0] }
  0xaf   :  { %1582 = vmatpush.bf16.msrb.mxu2 %v2144_v53  ;;  %v2848_v53 = vor.u32 %v3218_v42, %v2845_v43  ;;  %v3098_v42 = vld [vmem:[#allocation4 + $0x22c] sm:$0xf]  ;;  %v2365_v43 = vld [vmem:[#allocation4 + $0x238] sm:$0xf0] }
  0xb0   :  { %1557 = vmatpush.bf16.msra.mxu3 %v2764_v61  ;;  %v2432_v61 = vor.u32 %v3114_v50, %v2429_v52  ;;  %v3198_v50 = vld [vmem:[#allocation4 + $0x54c] sm:$0xf]  ;;  %v2765_v52 = vld [vmem:[#allocation4 + $0x558] sm:$0xf0] }
  0xb1   :  { %1595 = vmatpush.bf16.msra.mxu0 %v2272_v0  ;;  %v2560_v0 = vor.u32 %v3146_v54, %v2557_v56  ;;  %v2368_v54 = vor.u32 %v3098_v42, %v2365_v43  ;;  %v3162_v56 = vld [vmem:[#allocation4 + $0x42c] sm:$0xf]  ;;  %v3235_v42 = vld [vmem:[#allocation7 + $0x50] sm:$0xff] }
  0xb2   :  { %1545 = vmatpush.bf16.msra.mxu1 %v2620_v6  ;;  %v2688_v6 = vor.u32 %v3178_v62, %v2685_v63  ;;  %v3126_v62 = vld [vmem:[#allocation4 + $0x30c] sm:$0xf]  ;;  %v2768_v63 = vor.u32 %v3198_v50, %v2765_v52  ;;  %v3233_v50 = vld [vmem:[#allocation7 + $0x40] sm:$0xff] }
  0xb3   :  { %1583 = vmatpush.bf16.msrb.mxu2 %v2128_v3  ;;  %v2832_v3 = vor.u32 %v3214_v59, %v2829_v60  ;;  %v2496_v59 = vor.u32 %v3130_v46, %v2493_v47  ;;  %v3094_v60 = vld [vmem:[#allocation4 + $0x20c] sm:$0xf]  ;;  %v3225_v47 = vld [vmem:[#allocation7] sm:$0xff] }
  0xb4   :  { %1558 = vmatpush.bf16.msra.mxu3 %v2748_v11  ;;  %v3174_v11 = vld [vmem:[#allocation4 + $0x48c] sm:$0xf] }
  0xb5   :  { %1596 = vmatpush.bf16.msra.mxu0 %v2256_v15  ;;  %v2397_v15 = vld [vmem:[#allocation4 + $0x278] sm:$0xf0]  ;;  %v3222_v1 = vld [vmem:[#allocation4 + $0x60c] sm:$0xf] }
  0xb6   :  { %1546 = vmatpush.bf16.msra.mxu1 %v2604_v23  ;;  %v2400_v22 = vor.u32 %v3106_v14, %v2397_v15  ;;  %v3170_v23 = vld [vmem:[#allocation4 + $0x46c] sm:$0xf]  ;;  %v2864_v14 = vor.u32 %v3222_v1, %v2861_v2  ;;  %v3248_v1 = vld [vmem:[#allocation7 + $0xb8] sm:$0xff] }
  0xb7   :  { %1584 = vmatpush.bf16.msrb.mxu2 %v2112_v19  ;;  %v3506_v19 = vpop.f32.mrf.mxu0  ;;  %v3194_v5 = vld [vmem:[#allocation4 + $0x52c] sm:$0xf] }
  0xb8   :  { %1559 = vmatpush.bf16.msra.mxu3 %v2732_v26  ;;  %v2381_v26 = vld [vmem:[#allocation4 + $0x258] sm:$0xf0]  ;;  %v3234_v46 = vld [vmem:[#allocation7 + $0x48] sm:$0xff] }
  0xb9   :  { %1597 = vmatpush.bf16.msra.mxu0 %v2240_v32  ;;  %1547 = vmatmul.bf16.vlgmr.msra.gmra.mxu1 %v3482_v30  ;;  %v2656_v32 = vor.u32 %v3170_v23, %v2653_v24  ;;  %v3231_v23 = vld [vmem:[#allocation7 + $0x30] sm:$0xff] }
  0xba   :  { %1604 = vmatpush.bf16.msrb.mxu1 %v2464_v27  ;;  %v2800_v27 = vor.u32 %v3206_v20, %v2797_v21  ;;  %v2733_v20 = vld [vmem:[#allocation4 + $0x518] sm:$0xf0] }
  0xbb   :  { %1585 = vmatpush.bf16.msrb.mxu2 %v2096_v37  ;;  %1560 = vmatmul.bf16.vlgmr.msra.gmra.mxu3 %v3484_v35  ;;  %v2384_v37 = vor.u32 %v3102_v25, %v2381_v26  ;;  %v3240_v21 = vld [vmem:[#allocation7 + $0x78] sm:$0xff]  ;;  %v3239_v25 = vld [vmem:[#allocation7 + $0x70] sm:$0xff] }
  0xbc   :  { %1617 = vmatpush.bf16.msrb.mxu3 %v2592_v31  ;;  %v3508_v28 = vpop.f32.mrf.mxu1  ;;  %v2509_v31 = vld [vmem:[#allocation4 + $0x358] sm:$0xf0] }
  0xbd   :  { %1598 = vmatpush.bf16.msra.mxu0 %v2224_v49  ;;  %v3510_v36 = vpop.f32.mrf.mxu2  ;;  %v2512_v40 = vor.u32 %v3134_v29, %v2509_v31  ;;  %v2640_v49 = vor.u32 %v3166_v38, %v2637_v39  ;;  %v3227_v38 = vld [vmem:[#allocation7 + $0x10] sm:$0xff] }
  0xbe   :  { %1605 = vmatpush.bf16.msrb.mxu1 %v2448_v44  ;;  %1586 = vmatmul.bf16.vlgmr.msrb.gmra.mxu2 %v3468_v55  ;;  %v2672_v55 = vor.u32 %v3174_v11, %v2669_v12  ;;  %v2784_v44 = vor.u32 %v3202_v33, %v2781_v34  ;;  %v2605_v11 = vld [vmem:[#allocation4 + $0x418] sm:$0xf0]  ;;  %v3237_v33 = vld [vmem:[#allocation7 + $0x60] sm:$0xff] }
  0xbf   :  { %1630 = vmatpush.bf16.msra.mxu2 %v2720_v41  ;;  %v3228_v34 = vld [vmem:[#allocation7 + $0x18] sm:$0xff] }
  0xc0   :  { %1618 = vmatpush.bf16.msrb.mxu3 %v2576_v48  ;;  %1599 = vmatmul.bf16.vlgmr.msra.gmra.mxu0 %v3474_v7  ;;  %v2528_v7 = vor.u32 %v3138_v17, %v2525_v18  ;;  %v3512_v41 = vpop.f32.mrf.mxu3  ;;  %v1316_v48 = vpop.f32.mrf.mxu0 }
  0xc1   :  { %1643 = vmatpush.bf16.msrb.mxu0 %v2848_v53  ;;  %v3514_v53 = vld [vmem:[#allocation6] sm:$0xf] }
  0xc2   :  { %1606 = vmatpush.bf16.msrb.mxu1 %v2432_v61  ;;  %v2349_v61 = vld [vmem:[#allocation4 + $0x218] sm:$0xf0]  ;;  %v313_v12 = vperm.slane %v3514_v53, 0 }
  0xc3   :  { %1631 = vmatpush.bf16.msra.mxu2 %v2704_v58  ;;  %v2621_v58 = vld [vmem:[#allocation4 + $0x438] sm:$0xf0]  ;;  %v2352_v9 = vor.u32 %v3094_v60, %v2349_v61 }
  0xc4   :  { %1619 = vmatpush.bf16.msrb.mxu3 %v2560_v0  ;;  %v2477_v0 = vld [vmem:[#allocation4 + $0x318] sm:$0xf0]  ;;  %v2624_v4 = vor.u32 %v3162_v56, %v2621_v58 }
  0xc5   :  { %1644 = vmatpush.bf16.msrb.mxu0 %v2832_v3  ;;  %v1329_v3 = vpop.f32.mrf.mxu1  ;;  %v1342_v8 = vpop.f32.mrf.mxu2 }
  0xc6   :  { %1607 = vmatpush.bf16.msrb.mxu1 %v2416_v10  ;;  %v3158_v10 = vld [vmem:[#allocation4 + $0x40c] sm:$0xf] }
  0xc7   :  { %1632 = vmatpush.bf16.msra.mxu2 %v2688_v6  ;;  %v2749_v6 = vld [vmem:[#allocation4 + $0x538] sm:$0xf0]  ;;  %v2608_v18 = vor.u32 %v3158_v10, %v2605_v11  ;;  %v3246_v8 = vld [vmem:[#allocation7 + $0xa8] sm:$0xff] }
  0xc8   :  { %1620 = vmatpush.bf16.msrb.mxu3 %v2544_v13  ;;  %v2480_v13 = vor.u32 %v3126_v62, %v2477_v0  ;;  %v1355_v15 = vpop.f32.mrf.mxu3  ;;  %v2752_v17 = vor.u32 %v3194_v5, %v2749_v6 }
  0xc9   :  { %1645 = vmatpush.bf16.msrb.mxu0 %v2816_v16  ;;  %v3232_v16 = vld [vmem:[#allocation7 + $0x38] sm:$0xff] }
  0xca   :  { %1608 = vmatpush.bf16.msrb.mxu1 %v2400_v22  ;;  %v1315_v22 = vadd.f32 %v3506_v19, %v313_v12  ;;  %v3230_v19 = vld [vmem:[#allocation7 + $0x28] sm:$0xff] }
  0xcb   :  { %1633 = vmatpush.bf16.msra.mxu2 %v2672_v55  ;;  %v3190_v55 = vld [vmem:[#allocation4 + $0x50c] sm:$0xf] }
  0xcc   :  { %1621 = vmatpush.bf16.msrb.mxu3 %v2528_v7  ;;  %v2736_v24 = vor.u32 %v3190_v55, %v2733_v20  ;;  %v1328_v26 = vadd.f32 %v3508_v28, %v1315_v22 }
  0xcd   :  { %1646 = vmatpush.bf16.msrb.mxu0 %v2800_v27  ;;  %v1392_v7 = vpop.f32.mrf.mxu2  ;;  %v3238_v27 = vld [vmem:[#allocation7 + $0x68] sm:$0xff] }
  0xce   :  { %1609 = vmatpush.bf16.msrb.mxu1 %v2384_v37  ;;  %v1341_v29 = vadd.f32 %v3510_v36, %v1328_v26  ;;  %v3236_v37 = vld [vmem:[#allocation7 + $0x58] sm:$0xff] }
  0xcf   :  { %1634 = vmatpush.bf16.msra.mxu2 %v2656_v32  ;;  %v3256_v26 = vld [vmem:[#allocation7 + $0xf8] sm:$0xff] }
  0xd0   :  { %1622 = vmatpush.bf16.msrb.mxu3 %v2512_v40  ;;  %v1354_v28 = vadd.f32 %v3512_v41, %v1341_v29  ;;  %v315_v29 = vperm.slane %v3514_v53, 2 }
  0xd1   :  { %1647 = vmatpush.bf16.msrb.mxu0 %v2784_v44  ;;  %v3226_v44 = vld [vmem:[#allocation7 + $0x8] sm:$0xff] }
  0xd2   :  { %1610 = vmatpush.bf16.msrb.mxu1 %v2368_v54 }
  0xd3   :  { %1635 = vmatpush.bf16.msra.mxu2 %v2640_v49 }
  0xd4   :  { %1623 = vmatpush.bf16.msrb.mxu3 %v2496_v59 }
  0xd5   :  { %1648 = vmatpush.bf16.msrb.mxu0 %v2768_v63  ;;  %v1366_v31 = vpop.f32.mrf.mxu0  ;;  %v1394_v32 = vpop.f32.mrf.mxu2 }
  0xd6   :  { %1611 = vmatpush.bf16.msrb.mxu1 %v2352_v9 }
  0xd7   :  { %1636 = vmatpush.bf16.msra.mxu2 %v2624_v4  ;;  %v3247_v4 = vld [vmem:[#allocation7 + $0xb0] sm:$0xff] }
  0xd8   :  { %1624 = vmatpush.bf16.msrb.mxu3 %v2480_v13  ;;  %v3245_v13 = vld [vmem:[#allocation7 + $0xa0] sm:$0xff] }
  0xd9   :  { %1649 = vmatpush.bf16.msrb.mxu0 %v2752_v17  ;;  %1612 = vmatmul.bf16.vlgmr.msrb.gmra.mxu1 %v3466_v51  ;;  %v3229_v51 = vld [vmem:[#allocation7 + $0x20] sm:$0xff]  ;;  %v3244_v17 = vld [vmem:[#allocation7 + $0x98] sm:$0xff] }
  0xda   :  { %1663 = vmatpush.bf16.msra.mxu1 %v2864_v14 }
  0xdb   :  { %1637 = vmatpush.bf16.msra.mxu2 %v2608_v18  ;;  %1625 = vmatmul.bf16.vlgmr.msrb.gmra.mxu3 %v3470_v57  ;;  %v1379_v57 = vpop.f32.mrf.mxu1  ;;  %v3243_v18 = vld [vmem:[#allocation7 + $0x90] sm:$0xff] }
  0xdc   :  { %1937 = vmatpush.bf16.msra.mxu3 %v3232_v16 }
  0xdd   :  { %1650 = vmatpush.bf16.msrb.mxu0 %v2736_v24 }
  0xde   :  { %1950 = vmatpush.bf16.msrb.mxu1 %v3240_v21  ;;  %1638 = vmatmul.bf16.vlgmr.msra.gmra.mxu2 %v3482_v30  ;;  %v1367_v30 = vadd.f32 %v1366_v31, %v1354_v28  ;;  %v1405_v36 = vpop.f32.mrf.mxu3  ;;  %v3242_v21 = vld [vmem:[#allocation7 + $0x88] sm:$0xff] }
  0xdf   :  { %1963 = vmatpush.bf16.msrb.mxu2 %v3248_v1 }
  0xe0   :  { %1938 = vmatpush.bf16.msra.mxu3 %v3231_v23  ;;  %1651 = vmatmul.bf16.vlgmr.msrb.gmra.mxu0 %v3484_v35  ;;  %v1380_v39 = vadd.f32 %v1379_v57, %v1367_v30  ;;  %v1368_v35 = vpop.f32.mrf.mxu0  ;;  %v3241_v23 = vld [vmem:[#allocation7 + $0x80] sm:$0xff] }
  0xe1   :  { %v1418_v43 = vpop.f32.mrf.mxu2  ;;  %1976 = vmatpush.bf16.msra.mxu0 %v3256_v26 }
  0xe2   :  { %1951 = vmatpush.bf16.msrb.mxu1 %v3239_v25  ;;  %v1393_v41 = vadd.f32 %v1392_v7, %v1380_v39  ;;  %v3252_v39 = vld [vmem:[#allocation7 + $0xd8] sm:$0xff] }
  0xe3   :  { %v1381_v40 = vpop.f32.mrf.mxu1  ;;  %1964 = vmatpush.bf16.msrb.mxu2 %v3247_v4 }
  0xe4   :  { %1939 = vmatpush.bf16.msra.mxu3 %v3230_v19  ;;  %v1669_v48 = vmax.f32 %v1393_v41, 0.0  ;;  %v3255_v19 = vld [vmem:[#allocation7 + $0xf0] sm:$0xff] }
  0xe5   :  { %1977 = vmatpush.bf16.msra.mxu0 %v3255_v19  ;;  %v3257_v19 = vld [vmem:[#allocation9] sm:$0xff] }
  0xe6   :  { %1952 = vmatpush.bf16.msrb.mxu1 %v3238_v27  ;;  %v1407_v49 = vpop.f32.mrf.mxu3  ;;  %v1673_v54 = vpack.c.bf16 %v1669_v48, %v1669_v48  ;;  %v3250_v48 = vld [vmem:[#allocation7 + $0xc8] sm:$0xff] }
  0xe7   :  { %1965 = vmatpush.bf16.msrb.mxu2 %v3246_v8 }
  0xe8   :  { %1940 = vmatpush.bf16.msra.mxu3 %v3229_v51 }
  0xe9   :  { %2868 = vmatmul.msk.bf16.vlgmr.msra.gmra.mxu1 %vm1301_vm0, %v3478_v45  ;;  %v1420_v52 = vpop.f32.mrf.mxu2  ;;  %v314_v45 = vperm.slane %v3514_v53, 1 }
  0xea   :  { %1953 = vmatpush.bf16.msrb.mxu1 %v3237_v33  ;;  %v3254_v33 = vld [vmem:[#allocation7 + $0xe8] sm:$0xff] }
  0xeb   :  { %v1406_v56 = vadd.f32 %v1405_v36, %v314_v45  ;;  %1966 = vmatpush.bf16.msrb.mxu2 %v3245_v13  ;;  %1978 = vmatpush.bf16.msra.mxu0 %v3254_v33  ;;  %v3249_v45 = vld [vmem:[#allocation7 + $0xc0] sm:$0xff] }
  0xec   :  { %1941 = vmatpush.bf16.msra.mxu3 %v3228_v34  ;;  %v3253_v34 = vld [vmem:[#allocation7 + $0xe0] sm:$0xff] }
  0xed   :  { %v1419_v58 = vadd.f32 %v1418_v43, %v1406_v56  ;;  %v316_v56 = vperm.slane %v3514_v53, 3 }
  0xee   :  { %1954 = vmatpush.bf16.msrb.mxu1 %v3236_v37 }
  0xef   :  { %1967 = vmatpush.bf16.msrb.mxu2 %v3244_v17  ;;  %1979 = vmatpush.bf16.msra.mxu0 %v3253_v34 }
  0xf0   :  { %1942 = vmatpush.bf16.msra.mxu3 %v3227_v38 }
  0xf2   :  { %1955 = vmatpush.bf16.msrb.mxu1 %v3235_v42  ;;  %v3251_v42 = vld [vmem:[#allocation7 + $0xd0] sm:$0xff] }
  0xf3   :  { %1968 = vmatpush.bf16.msrb.mxu2 %v3243_v18  ;;  %1980 = vmatpush.bf16.msra.mxu0 %v3252_v39 }
  0xf4   :  { %1943 = vmatpush.bf16.msra.mxu3 %v3226_v44 }
  0xf5   :  { %v1431_v59 = vpop.f32.mrf.mxu0 }
  0xf6   :  { %1956 = vmatpush.bf16.msrb.mxu1 %v3234_v46  ;;  %v1432_v60 = vadd.f32 %v1431_v59, %v1419_v58  ;;  %v1444_v61 = vpop.f32.mrf.mxu1 }
  0xf7   :  { %1969 = vmatpush.bf16.msrb.mxu2 %v3242_v21  ;;  %1981 = vmatpush.bf16.msra.mxu0 %v3251_v42  ;;  %v3263_v21 = vld [vmem:[#allocation9 + $0x30] sm:$0xff] }
  0xf8   :  { %1944 = vmatpush.bf16.msra.mxu3 %v3225_v47  ;;  %v1445_v62 = vadd.f32 %v1444_v61, %v1432_v60 }
  0xfa   :  { %1957 = vmatpush.bf16.msrb.mxu1 %v3233_v50 }
  0xfb   :  { %1945 = vmatmul.bf16.vlgmr.msra.gmra.mxu3 %v1673_v54  ;;  %1970 = vmatpush.bf16.msrb.mxu2 %v3241_v23  ;;  %v3261_v23 = vld [vmem:[#allocation9 + $0x20] sm:$0xff] }
  0xfc   :  { %1982 = vmatpush.bf16.msra.mxu0 %v3250_v48 }
  0xfd   :  { %v1433_v63 = vpop.f32.mrf.mxu0 }
  0xfe   :  { %v1457_v0 = vpop.f32.mrf.mxu3  ;;  %v1446_v5 = vpop.f32.mrf.mxu1 }
  0xff   :  { %v1458_v2 = vadd.f32 %v1457_v0, %v1445_v62 }
 0x100   :  { %1983 = vmatpush.bf16.msra.mxu0 %v3249_v45 }
 0x101   :  { %v1470_v3 = vpop.f32.mrf.mxu2 }
 0x102   :  { %v1471_v6 = vadd.f32 %v1470_v3, %v1458_v2 }
 0x105   :  { %v1483_v9 = vpop.f32.mrf.mxu0 }
 0x106   :  { %v1459_v10 = vpop.f32.mrf.mxu3  ;;  %v1484_v11 = vadd.f32 %v1483_v9, %v1471_v6 }
 0x108   :  { %v1670_v14 = vmax.f32 %v1484_v11, 0.0 }
 0x109   :  { %v1472_v12 = vpop.f32.mrf.mxu2 }
 0x10a   :  { %v1674_v15 = vpack.c.bf16 %v1670_v14, %v1670_v14 }
 0x10c   :  { %1958 = vmatmul.bf16.vlgmr.msrb.gmra.mxu1 %v1674_v15  ;;  %v3274_v15 = vld [vmem:[%s3543_s4] ss:$0 sm:$0xff] }
 0x10d   :  { %v1485_v16 = vpop.f32.mrf.mxu0 }
 0x116   :  { %v1496_v20 = vpop.f32.mrf.mxu1 }
 0x117   :  { %v1497_v57 = vadd.f32 %v1496_v20, %v315_v29  ;;  %v3264_v20 = vld [vmem:[#allocation9 + $0x38] sm:$0xff] }
 0x118   :  { %2059 = vmatpush.bf16.msrb.mxu3 %v3264_v20 }
 0x119   :  { %v1522_v55 = vpop.f32.mrf.mxu0 }
 0x11c   :  { %2060 = vmatpush.bf16.msrb.mxu3 %v3263_v21 }
 0x11e   :  { %v1509_v22 = vpop.f32.mrf.mxu3  ;;  %v1498_v25 = vpop.f32.mrf.mxu1 }
 0x11f   :  { %v1510_v32 = vadd.f32 %v1509_v22, %v1497_v57  ;;  %v3262_v22 = vld [vmem:[#allocation9 + $0x28] sm:$0xff] }
 0x120   :  { %2061 = vmatpush.bf16.msrb.mxu3 %v3262_v22  ;;  %v3258_v25 = vld [vmem:[#allocation9 + $0x8] sm:$0xff] }
 0x121   :  { %v1524_v24 = vpop.f32.mrf.mxu0  ;;  %v1535_v7 = vpop.f32.mrf.mxu2  ;;  %v1523_v30 = vadd.f32 %v1522_v55, %v1510_v32 }
 0x122   :  { %v3260_v24 = vld [vmem:[#allocation9 + $0x18] sm:$0xff] }
 0x123   :  { %v1536_v38 = vadd.f32 %v1535_v7, %v1523_v30  ;;  %v3259_v7 = vld [vmem:[#allocation9 + $0x10] sm:$0xff] }
 0x124   :  { %2062 = vmatpush.bf16.msrb.mxu3 %v3261_v23 }
 0x126   :  { %v1511_v27 = vpop.f32.mrf.mxu3 }
 0x128   :  { %2063 = vmatpush.bf16.msrb.mxu3 %v3260_v24 }
 0x129   :  { %v1574_v51 = vpop.f32.mrf.mxu0  ;;  %v1537_v31 = vpop.f32.mrf.mxu2 }
 0x12c   :  { %2064 = vmatpush.bf16.msrb.mxu3 %v3259_v7 }
 0x130   :  { %2065 = vmatpush.bf16.msrb.mxu3 %v3258_v25 }
 0x131   :  { %v1576_v28 = vpop.f32.mrf.mxu0 }
 0x132   :  { %v3275_v28 = vld [vmem:[%s3545_s6] ss:$0 sm:$0xff] }
 0x134   :  { %2066 = vmatpush.bf16.msrb.mxu3 %v3257_v19 }
 0x136   :  { %v1548_v37 = vpop.f32.mrf.mxu1 }
 0x137   :  { %v1549_v35 = vadd.f32 %v1548_v37, %v1536_v38 }
 0x13d   :  { %v1600_v36 = vpop.f32.mrf.mxu0 }
 0x13e   :  { %v1561_v40 = vpop.f32.mrf.mxu3  ;;  %v1550_v44 = vpop.f32.mrf.mxu1 }
 0x13f   :  { %v1562_v43 = vadd.f32 %v1561_v40, %v1549_v35 }
 0x141   :  { %v1575_v41 = vadd.f32 %v1574_v51, %v1562_v43  ;;  %v1587_v46 = vpop.f32.mrf.mxu2 }
 0x142   :  { %v1588_v58 = vadd.f32 %v1587_v46, %v316_v56 }
 0x143   :  { %v1671_v47 = vmax.f32 %v1575_v41, 0.0 }
 0x144   :  { %v1601_v60 = vadd.f32 %v1600_v36, %v1588_v58 }
 0x145   :  { %v1675_v49 = vpack.c.bf16 %v1671_v47, %v1671_v47  ;;  %v1602_v50 = vpop.f32.mrf.mxu0 }
 0x146   :  { %v1563_v52 = vpop.f32.mrf.mxu3 }
 0x147   :  { %1971 = vmatmul.bf16.vlgmr.msrb.gmra.mxu2 %v1675_v49 }
 0x149   :  { %v1589_v54 = vpop.f32.mrf.mxu2 }
 0x156   :  { %v1613_v59 = vpop.f32.mrf.mxu1 }
 0x157   :  { %v1614_v61 = vadd.f32 %v1613_v59, %v1601_v60 }
 0x15d   :  { %v1652_v63 = vpop.f32.mrf.mxu0 }
 0x15e   :  { %v1626_v62 = vpop.f32.mrf.mxu3  ;;  %v1615_v1 = vpop.f32.mrf.mxu1 }
 0x15f   :  { %v1627_v0 = vadd.f32 %v1626_v62, %v1614_v61 }
 0x161   :  { %v1639_v2 = vpop.f32.mrf.mxu2 }
 0x162   :  { %v1640_v3 = vadd.f32 %v1639_v2, %v1627_v0 }
 0x164   :  { %v1653_v6 = vadd.f32 %v1652_v63, %v1640_v3 }
 0x165   :  { %v1654_v5 = vpop.f32.mrf.mxu0 }
 0x166   :  { %v1628_v4 = vpop.f32.mrf.mxu3  ;;  %v1665_v8 = vpop.f32.mrf.mxu1 }
 0x167   :  { %v1666_v9 = vadd.f32 %v1665_v8, %v1653_v6 }
 0x169   :  { %v1641_v10 = vpop.f32.mrf.mxu2  ;;  %v1672_v11 = vmax.f32 %v1666_v9, 0.0 }
 0x16b   :  { %v1676_v12 = vpack.c.bf16 %v1672_v11, %v1672_v11 }
 0x16d   :  { %1984 = vmatmul.bf16.vlgmr.msra.gmra.mxu0 %v1676_v12 }
 0x16e   :  { %v1667_v53 = vpop.f32.mrf.mxu1 }
 0x17e   :  { %v1946_v13 = vpop.f32.mrf.mxu3 }
 0x17f   :  { %v1947_v16 = vadd.f32 %v3274_v15, %v1946_v13 }
 0x186   :  { %v1948_v14 = vpop.f32.mrf.mxu3 }
 0x189   :  { %v1959_v17 = vpop.f32.mrf.mxu1 }
 0x18a   :  { %v1960_v18 = vadd.f32 %v1959_v17, %v1947_v16 }
 0x191   :  { %v1961_v55 = vpop.f32.mrf.mxu1 }
 0x1ca   :  { %v1972_v26 = vpop.f32.mrf.mxu2 }
 0x1cb   :  { %v1973_v29 = vadd.f32 %v1972_v26, %v1960_v18 }
 0x1d2   :  { %v1974_v27 = vpop.f32.mrf.mxu2 }
 0x1ea   :  { %v1985_v51 = vpop.f32.mrf.mxu0 }
 0x1eb   :  { %v1986_v31 = vadd.f32 %v1985_v51, %v1973_v29 }
 0x1ed   :  { %v1989_v57 = vmax.f32 %v1986_v31, 0.0 }
 0x1ef   :  { %v1990_v32 = vpack.c.bf16 %v1989_v57, %v1989_v57 }
 0x1f1   :  { %2067 = vmatmul.bf16.vlgmr.msrb.gmra.mxu3 %v1990_v32 }
 0x1f2   :  { %v1987_v33 = vpop.f32.mrf.mxu0 }
 0x274   :  { %v2068_v34 = vpop.f32.mrf.mxu3 }
 0x275   :  { %v2069_v30 = vadd.f32 %v3275_v28, %v2068_v34 }
 0x277   :  { %v2072_v37 = vpack.c.bf16 %v2069_v30, %v2069_v30 }
 0x279   :  { %2073 = vst [vmem:[%s3546_s7] sm:$0xf] %v2072_v37 }
 0x27c   :  { %v2070_v38 = vpop.f32.mrf.mxu3 }
 0x27d   :  { %2078 = vsyncpa [#allocation3], 1 }
 0x27e   :  { %2079 = vsyncpa [#allocation5], 1 }
 0x27f   :  { %2080 = vsyncpa [#allocation8], 1 }

</bundles_post_ra>
